<compile_context>
chip_gen: v7x
topology: tpu7x:2x2x1
jax: 0.10.0
libtpu: 0.0.40
codegen_flags: <defaults>
</compile_context>

<pallas_src>
import functools

import jax
import jax.numpy as jnp
from jax.experimental import pallas as pl
from jax.experimental.pallas import tpu as pltpu


def _round_up(v, m):
    return (v + m - 1) // m * m


@functools.lru_cache(maxsize=None)
def _vmem_limit_bytes():
    cap = 128 * 1024 * 1024
    try:
        cap = int(getattr(pltpu.get_tpu_info(), "vmem_capacity_bytes", cap))
    except Exception:  # interpret mode / no TPU visible at trace time
        pass
    return (cap // 4) * 3          # leave ~25% headroom for compiler scratch


# ---------------------------------------------------------------------------
# Fused Pallas kernel: cv1 -> BN -> SiLU -> cv2 -> BN -> SiLU (-> + x)
# ---------------------------------------------------------------------------
def _cross_conv_kernel(x_ref, w1_ref, s1_ref, b1_ref, w2_ref, s2_ref, b2_ref,
                       out_ref, y1_halo_ref, *, k, add, compute_dtype):
    """One whole image per grid step, everything resident in VMEM.

    x_ref       : (H, W, C1p)      channels-last input slab (original dtype)
    w1_ref      : (k*C1p, Cmp)     cv1 taps, flattened    s1/b1_ref : (1, Cmp)
    w2_ref      : (k*Cmp, C2p)     cv2 taps, flattened    s2/b2_ref : (1, C2p)
    out_ref     : (H, W, C2p)
    y1_halo_ref : (H + 2*pad, W, Cmp)  persistent VMEM scratch for the H-halo
    """
    H, W, C1p = x_ref.shape
    Cmp = y1_halo_ref.shape[-1]
    C2p = out_ref.shape[-1]
    pad = (k - 1) // 2

    # ---- cv1: (1, k) conv along W as ONE deep-K matmul + BN + SiLU --------
    x = x_ref[...].astype(compute_dtype)
    if pad > 0:
        zcols = jnp.zeros((H, pad, C1p), compute_dtype)
        x_wp = jnp.concatenate([zcols, x, zcols], axis=1)    # (H, W+2p, C1p)
    else:
        x_wp = x
    x_cat = jnp.concatenate([x_wp[:, t:t + W, :] for t in range(k)], axis=-1)
    y1 = jnp.dot(x_cat.reshape(H * W, k * C1p), w1_ref[...],
                 preferred_element_type=jnp.float32)
    y1 = y1 * s1_ref[...] + b1_ref[...]                      # folded BN (f32)
    y1 = y1 * jax.nn.sigmoid(y1)                             # SiLU (f32, EUP)

    # ---- stage cv1 output + zero halo rows in persistent VMEM scratch -----
    y1_halo_ref[pl.ds(pad, H)] = y1.astype(compute_dtype).reshape(H, W, Cmp)
    if pad > 0:                                              # cheap: 2*pad rows
        zrows = jnp.zeros((pad, W, Cmp), compute_dtype)
        y1_halo_ref[pl.ds(0, pad)] = zrows
        y1_halo_ref[pl.ds(H + pad, pad)] = zrows

    # ---- cv2: (k, 1) conv along H as ONE deep-K matmul + BN + SiLU --------
    y_cat = jnp.concatenate(
        [y1_halo_ref[pl.ds(t, H)].reshape(H * W, Cmp) for t in range(k)],
        axis=-1)
    y2 = jnp.dot(y_cat, w2_ref[...], preferred_element_type=jnp.float32)
    y2 = y2 * s2_ref[...] + b2_ref[...]
    y2 = y2 * jax.nn.sigmoid(y2)
    if add:                                                  # residual (C1p == C2p)
        # re-read the unconverted input: full-precision residual, and x is
        # otherwise dead through the cv2 section (lower live VMEM pressure).
        y2 = y2 + x_ref[...].astype(jnp.float32).reshape(H * W, C1p)
    out_ref[...] = y2.reshape(H, W, C2p).astype(out_ref.dtype)


# ---------------------------------------------------------------------------
# CrossConv forward wrapper
# ---------------------------------------------------------------------------
@functools.partial(jax.jit, static_argnames=("k", "add", "compute_dtype"))
def cross_conv(x_nchw, params, k=3, add=False, compute_dtype=jnp.bfloat16):
    """CrossConv forward.  x_nchw: (N, C1, H, W) -> (N, C2, H, W)."""
    assert k % 2 == 1, "CrossConv Pallas kernel only supports odd k (autopad)"
    N, C1, H, W = x_nchw.shape
    w1, w2 = params["w1"], params["w2"]           # (k, C1, Cm), (k, Cm, C2)
    Cm, C2 = w1.shape[2], w2.shape[2]
    add = bool(add) and (C1 == C2)                # mirror PyTorch `self.add`
    pad = (k - 1) // 2

    # Lane-dense channel padding (multiples of 128) for MXU/store efficiency.
    C1p, Cmp, C2p = (_round_up(c, 128) for c in (C1, Cm, C2))

    # Input stays in its original dtype; the kernel casts matmul operands.
    x = jnp.transpose(x_nchw, (0, 2, 3, 1))       # NHWC
    x = jnp.pad(x, ((0, 0), (0, 0), (0, 0), (0, C1p - C1)))

    # Pre-flatten weights to (k*Cin, Cout) for the single deep-K matmul.
    w1p = jnp.pad(w1, ((0, 0), (0, C1p - C1), (0, Cmp - Cm)))
    w1p = w1p.reshape(k * C1p, Cmp).astype(compute_dtype)
    w2p = jnp.pad(w2, ((0, 0), (0, Cmp - Cm), (0, C2p - C2)))
    w2p = w2p.reshape(k * Cmp, C2p).astype(compute_dtype)
    s1p = jnp.pad(params["s1"], ((0, 0), (0, Cmp - Cm))).astype(jnp.float32)
    b1p = jnp.pad(params["b1"], ((0, 0), (0, Cmp - Cm))).astype(jnp.float32)
    s2p = jnp.pad(params["s2"], ((0, 0), (0, C2p - C2))).astype(jnp.float32)
    b2p = jnp.pad(params["b2"], ((0, 0), (0, C2p - C2))).astype(jnp.float32)

    kernel = functools.partial(_cross_conv_kernel, k=k, add=add,
                               compute_dtype=compute_dtype)
    out = pl.pallas_call(
        kernel,
        out_shape=jax.ShapeDtypeStruct((N, H, W, C2p), x_nchw.dtype),
        grid=(N,),
        in_specs=[
            pl.BlockSpec((None, H, W, C1p), lambda n: (n, 0, 0, 0)),
            # constant block index -> weights/scale/bias stay resident in VMEM
            pl.BlockSpec((k * C1p, Cmp), lambda n: (0, 0)),
            pl.BlockSpec((1, Cmp), lambda n: (0, 0)),
            pl.BlockSpec((1, Cmp), lambda n: (0, 0)),
            pl.BlockSpec((k * Cmp, C2p), lambda n: (0, 0)),
            pl.BlockSpec((1, C2p), lambda n: (0, 0)),
            pl.BlockSpec((1, C2p), lambda n: (0, 0)),
        ],
        out_specs=pl.BlockSpec((None, H, W, C2p), lambda n: (n, 0, 0, 0)),
        scratch_shapes=[pltpu.VMEM((H + 2 * pad, W, Cmp), compute_dtype)],
        compiler_params=pltpu.CompilerParams(
            dimension_semantics=("parallel",),     # images split across TCs
            vmem_limit_bytes=_vmem_limit_bytes()),
    )(x, w1p, s1p, b1p, w2p, s2p, b2p)

    out = out[..., :C2]                            # drop channel padding
    return jnp.transpose(out, (0, 3, 1, 2))        # back to NCHW


# ---------------------------------------------------------------------------
# Deterministic synthetic parameters (PyTorch shapes, BatchNorm folded)
# ---------------------------------------------------------------------------
def make_params(key, c1, c2, k=3, e=1.0, eps=1e-5):
    c_ = int(c2 * e)
    ks = jax.random.split(key, 10)

    def fold_bn(kg, kb, km, kv, c):
        gamma = 1.0 + 0.1 * jax.random.normal(kg, (c,), jnp.float32)
        beta = 0.1 * jax.random.normal(kb, (c,), jnp.float32)
        mean = 0.1 * jax.random.normal(km, (c,), jnp.float32)
        var = jnp.abs(jax.random.normal(kv, (c,), jnp.float32)) + 0.5
        scale = gamma / jnp.sqrt(var + eps)
        bias = beta - mean * scale
        return scale[None, :], bias[None, :]

    # cv1 conv weight: PyTorch (c_, c1, 1, k)  -> stored as (k, c1, c_)
    w1 = 0.2 * jax.random.normal(ks[0], (k, c1, c_), jnp.float32)
    s1, b1 = fold_bn(ks[1], ks[2], ks[3], ks[4], c_)
    # cv2 conv weight: PyTorch (c2, c_, k, 1)  -> stored as (k, c_, c2)
    w2 = 0.2 * jax.random.normal(ks[5], (k, c_, c2), jnp.float32)
    s2, b2 = fold_bn(ks[6], ks[7], ks[8], ks[9], c2)
    return dict(w1=w1, s1=s1, b1=b1, w2=w2, s2=s2, b2=b2)


# ---------------------------------------------------------------------------
# Pure-JAX reference (lax.conv) for correctness checking
# ---------------------------------------------------------------------------
def ref_cross_conv(x_nchw, params, k=3, add=False):
    pad = (k - 1) // 2

    def conv_bn_silu(x, w_oihw, scale, bias, padding):
        y = jax.lax.conv_general_dilated(
            x, w_oihw, window_strides=(1, 1), padding=padding,
            dimension_numbers=("NCHW", "OIHW", "NCHW"))
        y = y * scale[0][None, :, None, None] + bias[0][None, :, None, None]
        return y * jax.nn.sigmoid(y)

    w1_oihw = jnp.transpose(params["w1"], (2, 1, 0))[:, :, None, :]  # (c_,c1,1,k)
    w2_oihw = jnp.transpose(params["w2"], (2, 1, 0))[:, :, :, None]  # (c2,c_,k,1)
    y = conv_bn_silu(x_nchw, w1_oihw, params["s1"], params["b1"],
                     [(0, 0), (pad, pad)])
    y = conv_bn_silu(y, w2_oihw, params["s2"], params["b2"],
                     [(pad, pad), (0, 0)])
    return x_nchw + y if add else y


if __name__ == "__main__":
    key = jax.random.PRNGKey(0)
    k_x, k_p = jax.random.split(key)

    N, C1, C2, H, W, K = 2, 4, 4, 16, 16, 3
    x = jax.random.normal(k_x, (N, C1, H, W), jnp.float32)
    params = make_params(k_p, C1, C2, k=K, e=1.0)

    ref = ref_cross_conv(x, params, k=K, add=False)
    ref_add = ref_cross_conv(x, params, k=K, add=True)

    # exact f32 matmul path (shortcut=False)
    out = jax.block_until_ready(
        cross_conv(x, params, k=K, add=False, compute_dtype=jnp.float32))
    assert out.shape == (N, C2, H, W)
    assert jnp.allclose(out, ref, rtol=1e-4, atol=1e-4), "mismatch (f32, add=False)"

    # exact f32 matmul path, shortcut=True and c1 == c2
    out_add = jax.block_until_ready(
        cross_conv(x, params, k=K, add=True, compute_dtype=jnp.float32))
    assert jnp.allclose(out_add, ref_add, rtol=1e-4, atol=1e-4), "mismatch (f32, add=True)"

    # default bf16 matmul fast path; BN/SiLU/residual stay f32 -> loose tolerance
    out_bf16 = jax.block_until_ready(cross_conv(x, params, k=K, add=False))
    assert jnp.allclose(out_bf16, ref, rtol=1e-1, atol=1e-1), "mismatch (bf16)"
    out_bf16_add = jax.block_until_ready(cross_conv(x, params, k=K, add=True))
    assert jnp.allclose(out_bf16_add, ref_add, rtol=1e-1, atol=1e-1), "mismatch (bf16, add=True)"

    print("KERNEL_OK")
</pallas_src>

<mosaic_0001>
module attributes {stable_mosaic.version = 11 : i64} {
  func.func @_cross_conv_kernel(%arg0: i32, %arg1: memref<1x16x16x128xf32, #tpu.memory_space<vmem>>, %arg2: memref<384x128xf32, #tpu.memory_space<vmem>>, %arg3: memref<1x128xf32, #tpu.memory_space<vmem>>, %arg4: memref<1x128xf32, #tpu.memory_space<vmem>>, %arg5: memref<384x128xf32, #tpu.memory_space<vmem>>, %arg6: memref<1x128xf32, #tpu.memory_space<vmem>>, %arg7: memref<1x128xf32, #tpu.memory_space<vmem>>, %arg8: memref<1x16x16x128xf32, #tpu.memory_space<vmem>>, %arg9: memref<18x16x128xf32, #tpu.memory_space<vmem>>) attributes {dimension_semantics = [#tpu.dimension_semantics<parallel>], iteration_bounds = array<i64: 2>, scalar_prefetch = 0 : i64, scratch_operands = 1 : i64, tpu.core_type = #tpu.core_type<tc>, window_params = [{transform_indices = @transform_0, window_bounds = array<i64: 1, 16, 16, 128>}, {pipeline_mode = #tpu.pipeline_mode<synchronous>, transform_indices = @transform_1, window_bounds = array<i64: 384, 128>}, {pipeline_mode = #tpu.pipeline_mode<synchronous>, transform_indices = @transform_2, window_bounds = array<i64: 1, 128>}, {pipeline_mode = #tpu.pipeline_mode<synchronous>, transform_indices = @transform_3, window_bounds = array<i64: 1, 128>}, {pipeline_mode = #tpu.pipeline_mode<synchronous>, transform_indices = @transform_4, window_bounds = array<i64: 384, 128>}, {pipeline_mode = #tpu.pipeline_mode<synchronous>, transform_indices = @transform_5, window_bounds = array<i64: 1, 128>}, {pipeline_mode = #tpu.pipeline_mode<synchronous>, transform_indices = @transform_6, window_bounds = array<i64: 1, 128>}, {transform_indices = @transform_7, window_bounds = array<i64: 1, 16, 16, 128>}]} {
    %c0 = arith.constant 0 : index
    %c0_0 = arith.constant 0 : index
    %c0_1 = arith.constant 0 : index
    %c0_2 = arith.constant 0 : index
    %0 = vector.load %arg1[%c0, %c0_0, %c0_1, %c0_2] : memref<1x16x16x128xf32, #tpu.memory_space<vmem>>, vector<1x16x16x128xf32>
    %1 = vector.shape_cast %0 : vector<1x16x16x128xf32> to vector<16x16x128xf32>
    %cst = arith.constant 0.000000e+00 : f32
    %2 = vector.broadcast %cst : f32 to vector<16x1x128xf32>
    %3 = tpu.concatenate %2, %1, %2 in 1 : vector<16x1x128xf32>, vector<16x16x128xf32>, vector<16x1x128xf32> -> vector<16x18x128xf32>
    %4 = vector.extract_strided_slice %3 {offsets = [0, 0, 0], sizes = [16, 16, 128], strides = [1, 1, 1]} : vector<16x18x128xf32> to vector<16x16x128xf32>
    %5 = vector.extract_strided_slice %3 {offsets = [0, 1, 0], sizes = [16, 16, 128], strides = [1, 1, 1]} : vector<16x18x128xf32> to vector<16x16x128xf32>
    %6 = vector.extract_strided_slice %3 {offsets = [0, 2, 0], sizes = [16, 16, 128], strides = [1, 1, 1]} : vector<16x18x128xf32> to vector<16x16x128xf32>
    %7 = tpu.concatenate %4, %5, %6 in 2 : vector<16x16x128xf32>, vector<16x16x128xf32>, vector<16x16x128xf32> -> vector<16x16x384xf32>
    %8 = vector.shape_cast %7 : vector<16x16x384xf32> to vector<256x384xf32>
    %c0_3 = arith.constant 0 : index
    %c0_4 = arith.constant 0 : index
    %9 = vector.load %arg2[%c0_3, %c0_4] : memref<384x128xf32, #tpu.memory_space<vmem>>, vector<384x128xf32>
    %cst_5 = arith.constant dense<0.000000e+00> : vector<256x128xf32>
    %10 = tpu.matmul %8, %9, %cst_5 {dimension_numbers = #tpu.dot_dimension_numbers<[1], [0], [0], [1], [0, 0, 1, 1], [], []>} : vector<256x384xf32>, vector<384x128xf32>, vector<256x128xf32> -> vector<256x128xf32>
    %c0_6 = arith.constant 0 : index
    %c0_7 = arith.constant 0 : index
    %11 = vector.load %arg3[%c0_6, %c0_7] : memref<1x128xf32, #tpu.memory_space<vmem>>, vector<1x128xf32>
    %12 = vector.broadcast %11 : vector<1x128xf32> to vector<256x128xf32>
    %13 = arith.mulf %10, %12 : vector<256x128xf32>
    %c0_8 = arith.constant 0 : index
    %c0_9 = arith.constant 0 : index
    %14 = vector.load %arg4[%c0_8, %c0_9] : memref<1x128xf32, #tpu.memory_space<vmem>>, vector<1x128xf32>
    %15 = vector.broadcast %14 : vector<1x128xf32> to vector<256x128xf32>
    %16 = arith.addf %13, %15 : vector<256x128xf32>
    %17 = arith.negf %16 : vector<256x128xf32>
    %18 = math.exp %17 : vector<256x128xf32>
    %cst_10 = arith.constant 1.000000e+00 : f32
    %19 = vector.broadcast %cst_10 : f32 to vector<256x128xf32>
    %20 = arith.addf %19, %18 : vector<256x128xf32>
    %21 = arith.divf %19, %20 : vector<256x128xf32>
    %22 = arith.mulf %16, %21 : vector<256x128xf32>
    %23 = vector.shape_cast %22 : vector<256x128xf32> to vector<16x16x128xf32>
    %c1 = arith.constant 1 : index
    %c0_11 = arith.constant 0 : index
    %c0_12 = arith.constant 0 : index
    %24 = vector.load %arg9[%c1, %c0_11, %c0_12] : memref<18x16x128xf32, #tpu.memory_space<vmem>>, vector<16x16x128xf32>
    tpu.vector_store %arg9[%c1, %c0_11, %c0_12], %23 {strides = array<i32>} : memref<18x16x128xf32, #tpu.memory_space<vmem>>, vector<16x16x128xf32>,
    %cst_13 = arith.constant 0.000000e+00 : f32
    %25 = vector.broadcast %cst_13 : f32 to vector<1x16x128xf32>
    %c0_14 = arith.constant 0 : index
    %c0_15 = arith.constant 0 : index
    %c0_16 = arith.constant 0 : index
    %26 = vector.load %arg9[%c0_14, %c0_15, %c0_16] : memref<18x16x128xf32, #tpu.memory_space<vmem>>, vector<1x16x128xf32>
    tpu.vector_store %arg9[%c0_14, %c0_15, %c0_16], %25 {strides = array<i32>} : memref<18x16x128xf32, #tpu.memory_space<vmem>>, vector<1x16x128xf32>,
    %c17 = arith.constant 17 : index
    %c0_17 = arith.constant 0 : index
    %c0_18 = arith.constant 0 : index
    %27 = vector.load %arg9[%c17, %c0_17, %c0_18] : memref<18x16x128xf32, #tpu.memory_space<vmem>>, vector<1x16x128xf32>
    tpu.vector_store %arg9[%c17, %c0_17, %c0_18], %25 {strides = array<i32>} : memref<18x16x128xf32, #tpu.memory_space<vmem>>, vector<1x16x128xf32>,
    %c0_19 = arith.constant 0 : index
    %c0_20 = arith.constant 0 : index
    %c0_21 = arith.constant 0 : index
    %28 = vector.load %arg9[%c0_19, %c0_20, %c0_21] : memref<18x16x128xf32, #tpu.memory_space<vmem>>, vector<16x16x128xf32>
    %29 = vector.shape_cast %28 : vector<16x16x128xf32> to vector<256x128xf32>
    %c1_22 = arith.constant 1 : index
    %c0_23 = arith.constant 0 : index
    %c0_24 = arith.constant 0 : index
    %30 = vector.load %arg9[%c1_22, %c0_23, %c0_24] : memref<18x16x128xf32, #tpu.memory_space<vmem>>, vector<16x16x128xf32>
    %31 = vector.shape_cast %30 : vector<16x16x128xf32> to vector<256x128xf32>
    %c2 = arith.constant 2 : index
    %c0_25 = arith.constant 0 : index
    %c0_26 = arith.constant 0 : index
    %32 = vector.load %arg9[%c2, %c0_25, %c0_26] : memref<18x16x128xf32, #tpu.memory_space<vmem>>, vector<16x16x128xf32>
    %33 = vector.shape_cast %32 : vector<16x16x128xf32> to vector<256x128xf32>
    %34 = tpu.concatenate %29, %31, %33 in 1 : vector<256x128xf32>, vector<256x128xf32>, vector<256x128xf32> -> vector<256x384xf32>
    %c0_27 = arith.constant 0 : index
    %c0_28 = arith.constant 0 : index
    %35 = vector.load %arg5[%c0_27, %c0_28] : memref<384x128xf32, #tpu.memory_space<vmem>>, vector<384x128xf32>
    %cst_29 = arith.constant dense<0.000000e+00> : vector<256x128xf32>
    %36 = tpu.matmul %34, %35, %cst_29 {dimension_numbers = #tpu.dot_dimension_numbers<[1], [0], [0], [1], [0, 0, 1, 1], [], []>} : vector<256x384xf32>, vector<384x128xf32>, vector<256x128xf32> -> vector<256x128xf32>
    %c0_30 = arith.constant 0 : index
    %c0_31 = arith.constant 0 : index
    %37 = vector.load %arg6[%c0_30, %c0_31] : memref<1x128xf32, #tpu.memory_space<vmem>>, vector<1x128xf32>
    %38 = vector.broadcast %37 : vector<1x128xf32> to vector<256x128xf32>
    %39 = arith.mulf %36, %38 : vector<256x128xf32>
    %c0_32 = arith.constant 0 : index
    %c0_33 = arith.constant 0 : index
    %40 = vector.load %arg7[%c0_32, %c0_33] : memref<1x128xf32, #tpu.memory_space<vmem>>, vector<1x128xf32>
    %41 = vector.broadcast %40 : vector<1x128xf32> to vector<256x128xf32>
    %42 = arith.addf %39, %41 : vector<256x128xf32>
    %43 = arith.negf %42 : vector<256x128xf32>
    %44 = math.exp %43 : vector<256x128xf32>
    %cst_34 = arith.constant 1.000000e+00 : f32
    %45 = vector.broadcast %cst_34 : f32 to vector<256x128xf32>
    %46 = arith.addf %45, %44 : vector<256x128xf32>
    %47 = arith.divf %45, %46 : vector<256x128xf32>
    %48 = arith.mulf %42, %47 : vector<256x128xf32>
    %49 = vector.shape_cast %48 : vector<256x128xf32> to vector<16x16x128xf32>
    %c0_35 = arith.constant 0 : index
    %c0_36 = arith.constant 0 : index
    %c0_37 = arith.constant 0 : index
    %c0_38 = arith.constant 0 : index
    %50 = vector.load %arg8[%c0_35, %c0_36, %c0_37, %c0_38] : memref<1x16x16x128xf32, #tpu.memory_space<vmem>>, vector<1x16x16x128xf32>
    %51 = vector.shape_cast %50 : vector<1x16x16x128xf32> to vector<16x16x128xf32>
    %52 = vector.shape_cast %49 : vector<16x16x128xf32> to vector<1x16x16x128xf32>
    tpu.vector_store %arg8[%c0_35, %c0_36, %c0_37, %c0_38], %52 {strides = array<i32>} : memref<1x16x16x128xf32, #tpu.memory_space<vmem>>, vector<1x16x16x128xf32>,
    return
  }
  func.func @transform_0(%arg0: i32) -> (i32, i32, i32, i32) {
    %c0_i32 = arith.constant 0 : i32
    %c0_i32_0 = arith.constant 0 : i32
    %c0_i32_1 = arith.constant 0 : i32
    %c0_i32_2 = arith.constant 0 : i32
    return %arg0, %c0_i32, %c0_i32_0, %c0_i32_1 : i32, i32, i32, i32
  }
  func.func @transform_1(%arg0: i32) -> (i32, i32) {
    %c0_i32 = arith.constant 0 : i32
    %c0_i32_0 = arith.constant 0 : i32
    %c0_i32_1 = arith.constant 0 : i32
    return %c0_i32, %c0_i32_0 : i32, i32
  }
  func.func @transform_2(%arg0: i32) -> (i32, i32) {
    %c0_i32 = arith.constant 0 : i32
    %c0_i32_0 = arith.constant 0 : i32
    %c0_i32_1 = arith.constant 0 : i32
    return %c0_i32, %c0_i32_0 : i32, i32
  }
  func.func @transform_3(%arg0: i32) -> (i32, i32) {
    %c0_i32 = arith.constant 0 : i32
    %c0_i32_0 = arith.constant 0 : i32
    %c0_i32_1 = arith.constant 0 : i32
    return %c0_i32, %c0_i32_0 : i32, i32
  }
  func.func @transform_4(%arg0: i32) -> (i32, i32) {
    %c0_i32 = arith.constant 0 : i32
    %c0_i32_0 = arith.constant 0 : i32
    %c0_i32_1 = arith.constant 0 : i32
    return %c0_i32, %c0_i32_0 : i32, i32
  }
  func.func @transform_5(%arg0: i32) -> (i32, i32) {
    %c0_i32 = arith.constant 0 : i32
    %c0_i32_0 = arith.constant 0 : i32
    %c0_i32_1 = arith.constant 0 : i32
    return %c0_i32, %c0_i32_0 : i32, i32
  }
  func.func @transform_6(%arg0: i32) -> (i32, i32) {
    %c0_i32 = arith.constant 0 : i32
    %c0_i32_0 = arith.constant 0 : i32
    %c0_i32_1 = arith.constant 0 : i32
    return %c0_i32, %c0_i32_0 : i32, i32
  }
  func.func @transform_7(%arg0: i32) -> (i32, i32, i32, i32) {
    %c0_i32 = arith.constant 0 : i32
    %c0_i32_0 = arith.constant 0 : i32
    %c0_i32_1 = arith.constant 0 : i32
    %c0_i32_2 = arith.constant 0 : i32
    return %arg0, %c0_i32, %c0_i32_0, %c0_i32_1 : i32, i32, i32, i32
  }
}

</mosaic_0001>

<bundles_post_ra>
// kernel: cross_conv.1
= control target key start
LH: loop header
LB: loop body
LE: loop exit
PB: predicated region body
PF: predicated region fallthrough
CT: control target
= control target key end

     0   :  { %12 = vsyncpa [#allocation4], 0  ;;  %s5463_s0 = inlined_call_operand.hbm [shape: f32[2,16,16,128], index: 0, kind: input, shape index: {}]   ;;  %s5464_s1 = inlined_call_operand.hbm [shape: f32[384,128], index: 1, kind: input, shape index: {}]   ;;  %s5465_s2 = inlined_call_operand.hbm [shape: f32[1,128], index: 2, kind: input, shape index: {}]   ;;  %s5466_s3 = inlined_call_operand.hbm [shape: f32[1,128], index: 3, kind: input, shape index: {}]   ;;  %s5467_s4 = inlined_call_operand.hbm [shape: f32[384,128], index: 4, kind: input, shape index: {}]   ;;  %s5468_s5 = inlined_call_operand.hbm [shape: f32[1,128], index: 5, kind: input, shape index: {}]   ;;  %s5469_s6 = inlined_call_operand.hbm [shape: f32[1,128], index: 6, kind: input, shape index: {}]   ;;  %s5470_s7 = inlined_call_operand.hbm [shape: f32[2,16,16,128], index: 7, kind: output, shape index: {}]  }
   0x1   :  { %14 = vsyncpa [#allocation4 + $0x1], 0 }
   0x2   :  { %15 = vsyncpa [#allocation7], 0 }
   0x3   :  { %16 = vsyncpa [#allocation10], 0 }
   0x4   :  { %17 = vsyncpa [#allocation13], 0 }
   0x5   :  { %18 = vsyncpa [#allocation5], 0 }
   0x6   :  { %20 = vsyncpa [#allocation5 + $0x1], 0  ;;  %s3999_s24 = smov 0   ;;  %s4001_s25 = smov 0  }
   0x7   :  { %s4003_s26 = smov 0   ;;  %s4005_s27 = smov 0  }
   0x8 LB: > { %s3945_s28 = smov [#allocation6]   ;;  %s4020_s30 = sadd.s32 4294967295, %s3943_s27   ;;  %s3943_s27 = sphi %s4005_s27, %s5566_s27   ;;  %s3939_s26 = sphi %s4003_s26, %s5565_s26   ;;  %s3935_s25 = sphi %s4001_s25, %s5564_s25   ;;  %s3931_s24 = sphi %s3999_s24, %s5563_s24  }
   0x9   : > { %s221_s29 = sshll.u32 %s3945_s28, 4  ;;  %p2739_p0 = scmp.ge.s32.totalorder %s3943_s27, 1  ;;  %s4025_s29 = int_to_ptr.vmem [resolvable:$true] %s221_s29 }
   0xa   : > { %p5471_p1 = scmp.eq.s32.totalorder %s4020_s30, 0  ;;  %p209_p2 = scmp.lt.s32.totalorder %s3943_s27, 3 }
   0xb   : > { %s3946_s9 = smov [#allocation9]   ;;  %s3947_s12 = smov [#allocation12]  }
   0xc   : > { %p4027_p3 = pnand %p2739_p0, %p209_p2  ;;  %s246_s10 = sshll.u32 %s3946_s9, 4  ;;  %s4040_s10 = int_to_ptr.vmem [resolvable:$true] %s246_s10 }
   0xd   : > { %s270_s13 = sshll.u32 %s3947_s12, 4  ;;  %s3667_s16 = scalar_lea.hbm %s5464_s1, 6144  ;;  %s4042_s13 = int_to_ptr.vmem [resolvable:$true] %s270_s13 }
   0xe   : > { %s5493_s8 = scalar_select %p4027_p3, 1, 0 }
   0xf   : > { %p3326_p5 = pneg %p4027_p3  ;;  %p3668_p7 = scmp.ne.s32.totalorder %s5464_s1, %s3667_s16 }
  0x10   : > { %p3674_p11 = scmp.lt.u32.totalorder %s3667_s16, %s5464_s1 }
  0x11   : > { %p4036_p6 = pnand %p3326_p5, %p5471_p1 }
  0x13   : > { %p4052_p8 = pneg %p4036_p6 }
  0x15   : > { %p3670_p9 = pnand %p4052_p8, %p3668_p7 }
  0x17   : > { %p3671_p10 = pneg %p3670_p9 }
  0x19   : > { %p3676_p12 = pnand %p3674_p11, %p3671_p10 }
  0x1b   : > { %3679 = shalt.err (!%p3676_p12)
}
  0x1c   : > { %s3680_s22 = scalar_lea.vmem %s4025_s29, 6144  ;;  %p3688_p5 = scmp.lt.s32.totalorder %s4025_s29, %s4025_s29 }
  0x1d   : > { %p3681_p13 = scmp.ne.s32.totalorder %s4025_s29, %s3680_s22  ;;  %p3689_p4 = scmp.lt.s32.totalorder %s3680_s22, %s3680_s22 }
  0x1f   : > { %p3683_p0 = pnand %p3681_p13, %p4052_p8  ;;  %p3690_p7 = por %p3689_p4, %p3688_p5 }
  0x21   : > { %p3684_p2 = pneg %p3683_p0 }
  0x23   : > { %p3691_p9 = pnand %p3690_p7, %p3684_p2 }
  0x25   : > { %3694 = shalt.err (!%p3691_p9)
}
  0x26   : > { %s5473_s23 = smov 128   ;;  %s3949_s28 = smov 8  }
  0x27   : > { %3329 = dma.hbm_to_vmem [thread:$0]  (!%p4036_p6), %s5464_s1, 6144, %s4025_s29, [#allocation7], %s5473_s23, %s5473_s23, %s3949_s28  }
  0x28   : > { %s3695_s16 = scalar_lea.hbm %s5466_s3, 16 }
  0x29   : > { %p3696_p4 = scmp.ne.s32.totalorder %s5466_s3, %s3695_s16  ;;  %p3702_p12 = scmp.lt.u32.totalorder %s3695_s16, %s5466_s3 }
  0x2b   : > { %p3698_p10 = pnand %p3696_p4, %p4052_p8 }
  0x2d   : > { %p3699_p11 = pneg %p3698_p10 }
  0x2f   : > { %p3704_p13 = pnand %p3702_p12, %p3699_p11 }
  0x31   : > { %3707 = shalt.err (!%p3704_p13)
}
  0x32   : > { %s3708_s29 = scalar_lea.vmem %s4040_s10, 16  ;;  %s3715_s22 = scalar_lea.vmem %s4040_s10, 32 }
  0x33   : > { %p3709_p0 = scmp.ne.s32.totalorder %s4040_s10, %s3708_s29  ;;  %p3716_p7 = scmp.lt.s32.totalorder %s4040_s10, %s4040_s10 }
  0x34   : > { %p3717_p9 = scmp.lt.s32.totalorder %s3715_s22, %s3708_s29 }
  0x35   : > { %p3711_p2 = pnand %p3709_p0, %p4052_p8 }
  0x36   : > { %p3718_p4 = por %p3717_p9, %p3716_p7 }
  0x37   : > { %p3712_p5 = pneg %p3711_p2 }
  0x39   : > { %p3719_p10 = pnand %p3718_p4, %p3712_p5 }
  0x3b   : > { %3722 = shalt.err (!%p3719_p10)
}
  0x3c   : > { %3335 = dma.hbm_to_vmem [thread:$0]  (!%p4036_p6), %s5466_s3, 16, %s4040_s10, [#allocation10]  }
  0x3d   : > { %s3723_s16 = scalar_lea.hbm %s5468_s5, 16 }
  0x3e   : > { %p3724_p11 = scmp.ne.s32.totalorder %s5468_s5, %s3723_s16  ;;  %p3730_p0 = scmp.lt.u32.totalorder %s3723_s16, %s5468_s5 }
  0x40   : > { %p3726_p12 = pnand %p3724_p11, %p4052_p8 }
  0x42   : > { %p3727_p13 = pneg %p3726_p12 }
  0x44   : > { %p3732_p2 = pnand %p3730_p0, %p3727_p13 }
  0x46   : > { %3735 = shalt.err (!%p3732_p2)
}
  0x47   : > { %s3736_s10 = scalar_lea.vmem %s4042_s13, 16  ;;  %s3743_s29 = scalar_lea.vmem %s4042_s13, 32 }
  0x48   : > { %p3737_p5 = scmp.ne.s32.totalorder %s4042_s13, %s3736_s10  ;;  %p3744_p4 = scmp.lt.s32.totalorder %s4042_s13, %s4042_s13 }
  0x49   : > { %p3745_p10 = scmp.lt.s32.totalorder %s3743_s29, %s3736_s10 }
  0x4a   : > { %p3739_p7 = pnand %p3737_p5, %p4052_p8 }
  0x4b   : > { %p3746_p11 = por %p3745_p10, %p3744_p4 }
  0x4c   : > { %p3740_p9 = pneg %p3739_p7 }
  0x4e   : > { %p3747_p12 = pnand %p3746_p11, %p3740_p9 }
  0x50   : > { %3750 = shalt.err (!%p3747_p12)
}
  0x51   : > { %3341 = dma.hbm_to_vmem [thread:$0]  (!%p4036_p6), %s5468_s5, 16, %s4042_s13, [#allocation13]  }
  0x52   : > { %s3950_s12 = smov [#allocation8]   ;;  %s3951_s15 = smov [#allocation11]  }
  0x53   : > { %s235_s14 = sshll.u32 %s3950_s12, 4  ;;  %s256_s16 = sshll.u32 %s3951_s15, 4  ;;  %s236_s14 = int_to_ptr.vmem [resolvable:$true] %s235_s14  ;;  %s257_s16 = int_to_ptr.vmem [resolvable:$true] %s256_s16 }
  0x54   : > { %s3751_s20 = scalar_lea.hbm %s5465_s2, 16 }
  0x55   : > { %p3752_p13 = scmp.ne.s32.totalorder %s5465_s2, %s3751_s20  ;;  %p3758_p5 = scmp.lt.u32.totalorder %s3751_s20, %s5465_s2 }
  0x57   : > { %p3754_p0 = pnand %p3752_p13, %p4052_p8 }
  0x59   : > { %p3755_p2 = pneg %p3754_p0 }
  0x5b   : > { %p3760_p7 = pnand %p3758_p5, %p3755_p2 }
  0x5d   : > { %3763 = shalt.err (!%p3760_p7)
}
  0x5e   : > { %s3764_s13 = scalar_lea.vmem %s236_s14, 16  ;;  %s3771_s9 = scalar_lea.vmem %s236_s14, 32 }
  0x5f   : > { %p3765_p9 = scmp.ne.s32.totalorder %s236_s14, %s3764_s13  ;;  %p3772_p11 = scmp.lt.s32.totalorder %s236_s14, %s236_s14 }
  0x60   : > { %p3773_p12 = scmp.lt.s32.totalorder %s3771_s9, %s3764_s13 }
  0x61   : > { %p3767_p4 = pnand %p3765_p9, %p4052_p8 }
  0x62   : > { %p3774_p1 = por %p3773_p12, %p3772_p11 }
  0x63   : > { %p3768_p10 = pneg %p3767_p4 }
  0x65   : > { %p3775_p3 = pnand %p3774_p1, %p3768_p10 }
  0x67   : > { %3778 = shalt.err (!%p3775_p3)
}
  0x68   : > { %3332 = dma.hbm_to_vmem [thread:$0]  (!%p4036_p6), %s5465_s2, 16, %s236_s14, [#allocation7]  }
  0x69   : > { %s3779_s20 = scalar_lea.hbm %s5467_s4, 6144 }
  0x6a   : > { %p3780_p13 = scmp.ne.s32.totalorder %s5467_s4, %s3779_s20  ;;  %p3786_p3 = scmp.lt.u32.totalorder %s3779_s20, %s5467_s4 }
  0x6c   : > { %p3782_p0 = pnand %p3780_p13, %p4052_p8 }
  0x6e   : > { %p3783_p1 = pneg %p3782_p0 }
  0x70   : > { %p3788_p2 = pnand %p3786_p3, %p3783_p1 }
  0x72   : > { %3791 = shalt.err (!%p3788_p2)
}
  0x73   : > { %s3792_s13 = scalar_lea.vmem %s257_s16, 6144  ;;  %p3800_p4 = scmp.lt.s32.totalorder %s257_s16, %s257_s16 }
  0x74   : > { %p3793_p5 = scmp.ne.s32.totalorder %s257_s16, %s3792_s13  ;;  %p3801_p10 = scmp.lt.s32.totalorder %s3792_s13, %s3792_s13 }
  0x76   : > { %p3795_p7 = pnand %p3793_p5, %p4052_p8  ;;  %p3802_p11 = por %p3801_p10, %p3800_p4 }
  0x78   : > { %p3796_p9 = pneg %p3795_p7 }
  0x7a   : > { %p3803_p12 = pnand %p3802_p11, %p3796_p9 }
  0x7c   : > { %3806 = shalt.err (!%p3803_p12)
}
  0x7d   : > { %3338 = dma.hbm_to_vmem [thread:$0]  (!%p4036_p6), %s5467_s4, 6144, %s257_s16, [#allocation10], %s5473_s23, %s5473_s23, %s3949_s28  }
  0x7e   : > { %s3952_s12 = smov [#allocation14]   ;;  %s3807_s20 = scalar_lea.hbm %s5469_s6, 16 }
  0x7f   : > { %s281_s15 = sshll.u32 %s3952_s12, 4  ;;  %p3808_p13 = scmp.ne.s32.totalorder %s5469_s6, %s3807_s20  ;;  %s282_s15 = int_to_ptr.vmem [resolvable:$true] %s281_s15 }
  0x80   : > { %p3814_p3 = scmp.lt.u32.totalorder %s3807_s20, %s5469_s6 }
  0x81   : > { %p3810_p0 = pnand %p3808_p13, %p4052_p8 }
  0x83   : > { %p3811_p1 = pneg %p3810_p0 }
  0x85   : > { %p3816_p2 = pnand %p3814_p3, %p3811_p1 }
  0x87   : > { %3819 = shalt.err (!%p3816_p2)
}
  0x88   : > { %s3820_s16 = scalar_lea.vmem %s282_s15, 16  ;;  %s3827_s13 = scalar_lea.vmem %s282_s15, 32 }
  0x89   : > { %p3821_p5 = scmp.ne.s32.totalorder %s282_s15, %s3820_s16  ;;  %p3828_p4 = scmp.lt.s32.totalorder %s282_s15, %s282_s15 }
  0x8a   : > { %p3829_p10 = scmp.lt.s32.totalorder %s3827_s13, %s3820_s16 }
  0x8b   : > { %p3823_p7 = pnand %p3821_p5, %p4052_p8 }
  0x8c   : > { %p3830_p11 = por %p3829_p10, %p3828_p4 }
  0x8d   : > { %p3824_p9 = pneg %p3823_p7 }
  0x8f   : > { %p3831_p12 = pnand %p3830_p11, %p3824_p9 }
  0x91   : > { %3834 = shalt.err (!%p3831_p12)
}
  0x92   : > { %3344 = dma.hbm_to_vmem [thread:$0]  (!%p4036_p6), %s5469_s6, 16, %s282_s15, [#allocation13]  }
  0x93   : > { %s2738_s19 = sadd.s32 4294967294, %s3943_s27   ;;  %s4183_s11 = sadd.s32 1, %s3943_s27  }
  0x94   : > { %s30_s12 = ssub.s32 %s3943_s27, %s4183_s11  ;;  %s33_s17 = sadd.s32 1, %s3939_s26 }
  0x95   : > { %p31_p8 = scmp.eq.s32.totalorder %s30_s12, 0  ;;  %p40_p13 = scmp.ne.s32.totalorder %s3939_s26, %s3935_s25 }
  0x96   : > { %p41_p0 = scmp.eq.s32.totalorder %s3943_s27, 0  ;;  %p46_p1 = scmp.ne.s32.totalorder %s3935_s25, %s3931_s24 }
  0x97   : > { %s4194_s18 = scalar_select %p31_p8, %s3939_s26, %s33_s17  }
  0x98   : > { %p4196_p3 = por %p41_p0, %p40_p13  ;;  %p5497_p2 = scmp.eq.s32.totalorder %s4020_s30, 0 }
  0x99   : > { %p196_p5 = scmp.eq.s32.totalorder %s4020_s30, 1  ;;  %p202_p7 = scmp.eq.s32.totalorder %s2738_s19, 1 }
  0x9a   : > { %p4202_p6 = por %p5497_p2, %p46_p1  ;;  %p3359_p9 = scmp.lt.s32.totalorder %s3943_s27, 2 }
  0x9b   : > { %s292_s21 = sand.u32 1, %s3939_s26   ;;  %p4209_p4 = por %p196_p5, %p40_p13 }
  0x9c   : > { %p4213_p10 = por %p202_p7, %p46_p1  ;;  %s2747_s22 = sshll.u32 %s292_s21, 8 }
  0x9d   : > { %s5499_s10 = scalar_select %p4209_p4, 1, 0 }
  0x9e   : > { %s5500_s29 = scalar_select %p4213_p10, 1, 0 }
  0x9f   : > { %s2864_s16 = sshll.u32 %s3943_s27, 12  ;;  %s296_s19 = scalar_lea.vmem [#allocation3], %s2747_s22 }
  0xa0   : > { %s4221_s9 = scalar_lea.hbm %s5463_s0, %s2864_s16  ;;  %s303_s12 = sshll.u32 %s296_s19, 4  ;;  %s4223_s12 = int_to_ptr.vmem [resolvable:$true] %s303_s12 }
  0xa1   : > { %p4227_p11 = pnand %p3359_p9, %p4196_p3  ;;  %s4231_s23 = scalar_lea.sflag [#allocation4], %s292_s21 }
  0xa2   : > { %s3835_s13 = scalar_lea.hbm %s4221_s9, 4096  ;;  %s3840_s20 = scalar_lea.hbm %s5463_s0, 8192 }
  0xa3   : > { %p3836_p12 = scmp.ne.s32.totalorder %s4221_s9, %s3835_s13  ;;  %p3837_p8 = pneg %p4227_p11 }
  0xa4   : > { %p3841_p1 = scmp.lt.u32.totalorder %s4221_s9, %s5463_s0  ;;  %p3842_p3 = scmp.lt.u32.totalorder %s3840_s20, %s3835_s13 }
  0xa5   : > { %p3838_p13 = pnand %p3837_p8, %p3836_p12  ;;  %p3844_p5 = scmp.lt.u32.totalorder %s3835_s13, %s4221_s9 }
  0xa6   : > { %p3843_p2 = por %p3842_p3, %p3841_p1 }
  0xa7   : > { %p3839_p0 = pneg %p3838_p13 }
  0xa8   : > { %p3845_p7 = por %p3844_p5, %p3843_p2 }
  0xaa   : > { %p3846_p9 = pnand %p3845_p7, %p3839_p0 }
  0xac   : > { %3849 = shalt.err (!%p3846_p9)
}
  0xad   : > { %s3850_s21 = scalar_lea.vmem %s4223_s12, 4096  ;;  %s3953_s22 = smov [#allocation3]  }
  0xae   : > { %p3851_p12 = scmp.ne.s32.totalorder %s4223_s12, %s3850_s21  ;;  %s3855_s16 = sshll.u32 %s3953_s22, 4  ;;  %s3856_s16 = int_to_ptr.vmem [resolvable:$false] %s3855_s16 }
  0xaf   : > { %s3857_s14 = scalar_lea.vmem %s3856_s16, 8192  ;;  %p3858_p4 = scmp.lt.s32.totalorder %s4223_s12, %s3856_s16 }
  0xb0   : > { %p3853_p13 = pnand %p3851_p12, %p3837_p8  ;;  %p3859_p1 = scmp.lt.s32.totalorder %s3857_s14, %s3850_s21 }
  0xb2   : > { %p3854_p10 = pneg %p3853_p13  ;;  %p3860_p3 = por %p3859_p1, %p3858_p4 }
  0xb4   : > { %p3861_p2 = pnand %p3860_p3, %p3854_p10 }
  0xb6   : > { %3864 = shalt.err (!%p3861_p2)
}
  0xb7   : > { %s5502_s13 = smov 128   ;;  %p5503_p8 = scmp.ne.s32.totalorder %s5493_s8, 0 }
  0xb8   : > { %3348 = dma.hbm_to_vmem [thread:$0]  (!%p4227_p11), %s4221_s9, 4096, %s4223_s12, %s4231_s23, %s5502_s13, %s5502_s13, %s3949_s28  }
  0xb9   : > { %315 = sbr.rel (%p5503_p8) target bundleno = 923 (0x39b), region = 48 }
  0xc0   : > { %s4265_s20 = sand.u32 1, %s3935_s25  }
  0xc1   : > { %s2751_s19 = sshll.u32 %s4265_s20, 8  ;;  %s318_s21 = scalar_lea.sflag [#allocation4], %s4265_s20 }
  0xc2   : > { %s4271_s17 = scalar_lea.vmem [#allocation3], %s2751_s19 }
  0xc3   : > { %3910 = dma.done.wait (%p4202_p6), %s318_s21, 4096  }
  0xc4   : > { %3912 = vsyncadd (%p4202_p6), %s318_s21, 4294963200  ;;  %p5504_p4 = scmp.eq.s32.totalorder %s4020_s30, 0 }
  0xc6   : > { %3914 = dma.done.wait (%p5504_p4), [#allocation7], 6160   ;;  %p5505_p10 = pmov %p5504_p4 }
  0xc7   : > { %p5506_p11 = pmov %p5504_p4 }
  0xc8   : > { %3916 = vsyncadd (%p5505_p10), [#allocation7], 4294961136 }
  0xc9   : > { %3918 = dma.done.wait (%p5506_p11), [#allocation10], 6160   ;;  %p5507_p0 = pmov %p5504_p4 }
  0xcb   : > { %3920 = vsyncadd (%p5507_p0), [#allocation10], 4294961136  ;;  %p5508_p5 = pmov %p5507_p0 }
  0xcc   : > { %p5509_p7 = pmov %p5507_p0 }
  0xcd   : > { %3922 = dma.done.wait (%p5508_p5), [#allocation13], 32  }
  0xce   : > { %3924 = vsyncadd (%p5509_p7), [#allocation13], 4294967264  ;;  %v5475_v0 = vmov 0.0|0.0   ;;  %v827_v1 = vld [vmem:[#allocation6] sm:$0xff]  ;;  %v828_v2 = vld [vmem:[#allocation6 + $0x8] sm:$0xff]  ;;  %vm440_vm0 = vcmask 1040384  }
  0xcf   : > { %3122 = vmatprep.subr.bf16.mxu0 %v5475_v0  ;;  %v829_v3 = vld [vmem:[#allocation6 + $0x10] sm:$0xff]  ;;  %v3123_v4 = vpack.c.bf16 %v828_v2, %v827_v1  ;;  %v830_v5 = vld [vmem:[#allocation6 + $0x18] sm:$0xff]  ;;  %v831_v7 = vld [vmem:[#allocation6 + $0x20] sm:$0xff]  ;;  %vm714_vm1 = vcmask 1045504   ;;  %vm601_vm2 = vcmask 1046528   ;;  %s5251_s8 = scalar_lea.vmem [#allocation15], %s2751_s19 }
  0xd0   : > { %v3126_v6 = vpack.c.bf16 %v830_v5, %v829_v3  ;;  %v832_v8 = vld [vmem:[#allocation6 + $0x28] sm:$0xff]  ;;  %v859_v9 = vld [vmem:[#allocation6 + $0x100] sm:$0xff]  ;;  %v861_v12 = vld [vmem:[#allocation6 + $0x110] sm:$0xff]  ;;  %s2865_s23 = sshll.u32 %s4020_s30, 12  ;;  %s2608_s28 = sshll.u32 %s5251_s8, 4  ;;  %s5418_s28 = int_to_ptr.vmem [resolvable:$true] %s2608_s28 }
  0xd1   : > { %3124 = vmatpush1.bf16.msra.mxu0 %v3123_v4  ;;  %v860_v10 = vld [vmem:[#allocation6 + $0x108] sm:$0xff]  ;;  %v3129_v13 = vpack.c.bf16 %v832_v8, %v831_v7  ;;  %v833_v14 = vld [vmem:[#allocation6 + $0x30] sm:$0xff]  ;;  %v862_v15 = vld [vmem:[#allocation6 + $0x118] sm:$0xff]  ;;  %s5416_s12 = scalar_lea.hbm %s5470_s7, %s2865_s23  ;;  %s2595_s22 = scalar_lea.sflag [#allocation5], %s4265_s20 }
  0xd2   : > { %3125 = vmatprep.subr.bf16.mxu0 %v5475_v0  ;;  %v3170_v11 = vpack.c.bf16 %v860_v10, %v859_v9  ;;  %v834_v16 = vld [vmem:[#allocation6 + $0x38] sm:$0xff]  ;;  %v3174_v17 = vpack.c.bf16 %v862_v15, %v861_v12  ;;  %v863_v18 = vld [vmem:[#allocation6 + $0x120] sm:$0xff]  ;;  %v864_v19 = vld [vmem:[#allocation6 + $0x128] sm:$0xff]  ;;  %s3865_s16 = scalar_lea.vmem %s5418_s28, 4096  ;;  %p5560_p9 = scmp.ne.s32.totalorder %s5499_s10, 0 }
  0xd3   : > { %v3178_v20 = vpack.c.bf16 %v864_v19, %v863_v18  ;;  %v3132_v21 = vpack.c.bf16 %v834_v16, %v833_v14  ;;  %v865_v22 = vld [vmem:[#allocation6 + $0x130] sm:$0xff]  ;;  %v866_v23 = vld [vmem:[#allocation6 + $0x138] sm:$0xff]  ;;  %v835_v24 = vld [vmem:[#allocation6 + $0x40] sm:$0xff]  ;;  %p3866_p6 = scmp.ne.s32.totalorder %s5418_s28, %s3865_s16  ;;  %s3956_s30 = smov [#allocation15]  }
  0xd4   : > { %3171 = vmatprep.subr.bf16.mxu1 %v3170_v11  ;;  %v836_v25 = vld [vmem:[#allocation6 + $0x48] sm:$0xff]  ;;  %v3182_v26 = vpack.c.bf16 %v866_v23, %v865_v22  ;;  %v837_v28 = vld [vmem:[#allocation6 + $0x50] sm:$0xff]  ;;  %v867_v29 = vld [vmem:[#allocation6 + $0x140] sm:$0xff]  ;;  %s3869_s14 = sshll.u32 %s3956_s30, 4  ;;  %s3870_s14 = int_to_ptr.vmem [resolvable:$false] %s3869_s14 }
  0xd5   : > { %3127 = vmatpush1.bf16.msra.mxu0 %v3126_v6  ;;  %3173 = vmatpush3.bf16.msra.mxu1 %v3170_v11  ;;  %v3135_v27 = vpack.c.bf16 %v836_v25, %v835_v24  ;;  %v868_v30 = vld [vmem:[#allocation6 + $0x148] sm:$0xff]  ;;  %v838_v31 = vld [vmem:[#allocation6 + $0x58] sm:$0xff]  ;;  %v376_v32 = vld [vmem:[%s4271_s17] sm:$0xff]  ;;  %p3867_p12 = pnand %p3866_p6, %p5560_p9  ;;  %s3871_s13 = scalar_lea.vmem %s3870_s14, 8192 }
  0xd6   : > { %3128 = vmatprep.subr.bf16.mxu0 %v5475_v0  ;;  %3175 = vmatprep.subr.bf16.mxu1 %v3174_v17  ;;  %v377_v33 = vld [vmem:[%s4271_s17 + $0x8] sm:$0xff]  ;;  %v4296_v34 = vrot.slane %v376_v32, 7  ;;  %v3186_v36 = vpack.c.bf16 %v868_v30, %v867_v29  ;;  %v3138_v37 = vpack.c.bf16 %v838_v31, %v837_v28  ;;  %v869_v38 = vld [vmem:[#allocation6 + $0x150] sm:$0xff]  ;;  %v870_v39 = vld [vmem:[#allocation6 + $0x158] sm:$0xff]  ;;  %p3872_p1 = scmp.lt.s32.totalorder %s5418_s28, %s3870_s14  ;;  %p3873_p3 = scmp.lt.s32.totalorder %s3871_s13, %s3865_s16 }
  0xd7   : > { %v442_v35 = vrot.slane %v377_v33, 7  ;;  %v839_v42 = vld [vmem:[#allocation6 + $0x60] sm:$0xff]  ;;  %v840_v43 = vld [vmem:[#allocation6 + $0x68] sm:$0xff]  ;;  %v3190_v48 = vpack.c.bf16 %v870_v39, %v869_v38  ;;  %v841_v51 = vld [vmem:[#allocation6 + $0x70] sm:$0xff]  ;;  %p3868_p13 = pneg %p3867_p12 }
  0xd8   : > { %v537_v41 = vsel %vm440_vm0, 0.0, %v4296_v34  ;;  %v3141_v50 = vpack.c.bf16 %v840_v43, %v839_v42  ;;  %v871_v52 = vld [vmem:[#allocation6 + $0x160] sm:$0xff]  ;;  %v872_v53 = vld [vmem:[#allocation6 + $0x168] sm:$0xff]  ;;  %v842_v55 = vld [vmem:[#allocation6 + $0x78] sm:$0xff]  ;;  %p3874_p2 = por %p3873_p3, %p3872_p1 }
  0xd9   : > { %3130 = vmatpush1.bf16.msra.mxu0 %v3129_v13  ;;  %3177 = vmatpush3.bf16.msra.mxu1 %v3174_v17  ;;  %v4300_v40 = vsel %vm440_vm0, %v4296_v34, %v442_v35  ;;  %v715_v44 = vrot.slane %v537_v41, 2  ;;  %v602_v46 = vrot.slane %v537_v41, 1  ;;  %v378_v56 = vld [vmem:[%s4271_s17 + $0x10] sm:$0xff]  ;;  %v379_v57 = vld [vmem:[%s4271_s17 + $0x18] sm:$0xff]  ;;  %v3194_v58 = vpack.c.bf16 %v872_v53, %v871_v52  ;;  %v380_v1 = vld [vmem:[%s4271_s17 + $0x20] sm:$0xff] }
  0xda   : > { %3131 = vmatprep.subr.bf16.mxu0 %v5475_v0  ;;  %3179 = vmatprep.subr.bf16.mxu1 %v3178_v20  ;;  %v716_v45 = vrot.slane %v4300_v40, 2  ;;  %v603_v47 = vrot.slane %v4300_v40, 1  ;;  %v873_v59 = vld [vmem:[#allocation6 + $0x170] sm:$0xff]  ;;  %v3144_v60 = vpack.c.bf16 %v842_v55, %v841_v51  ;;  %v874_v61 = vld [vmem:[#allocation6 + $0x178] sm:$0xff]  ;;  %v4316_v62 = vrot.slane %v378_v56, 7  ;;  %v381_v2 = vld [vmem:[%s4271_s17 + $0x28] sm:$0xff]  ;;  %p3875_p8 = pnand %p3874_p2, %p3868_p13 }
  0xdb   : > { %v445_v63 = vrot.slane %v379_v57, 7  ;;  %v843_v3 = vld [vmem:[#allocation6 + $0x80] sm:$0xff]  ;;  %v844_v4 = vld [vmem:[#allocation6 + $0x88] sm:$0xff]  ;;  %v845_v5 = vld [vmem:[#allocation6 + $0x90] sm:$0xff]  ;;  %v3198_v7 = vpack.c.bf16 %v874_v61, %v873_v59  ;;  %v4322_v8 = vsel %vm440_vm0, %v442_v35, 0.0  ;;  %v4324_v9 = vrot.slane %v380_v1, 7 }
  0xdc   : > { %v717_v49 = vsel %vm714_vm1, %v715_v44, %v716_v45  ;;  %v604_v54 = vsel %vm601_vm2, %v602_v46, %v603_v47  ;;  %v846_v6 = vld [vmem:[#allocation6 + $0x98] sm:$0xff]  ;;  %v448_v10 = vrot.slane %v381_v2, 7  ;;  %v3147_v11 = vpack.c.bf16 %v844_v4, %v843_v3  ;;  %v382_v14 = vld [vmem:[%s4271_s17 + $0x30] sm:$0xff]  ;;  %v847_v18 = vld [vmem:[#allocation6 + $0xa0] sm:$0xff] }
  0xdd   : > { %3133 = vmatpush1.bf16.msra.mxu0 %v3132_v21  ;;  %3181 = vmatpush3.bf16.msra.mxu1 %v3178_v20  ;;  %v4328_v12 = vsel %vm440_vm0, %v4316_v62, %v445_v63  ;;  %v4332_v13 = vsel %vm440_vm0, 0.0, %v4316_v62  ;;  %v383_v15 = vld [vmem:[%s4271_s17 + $0x38] sm:$0xff]  ;;  %v3150_v16 = vpack.c.bf16 %v846_v6, %v845_v5  ;;  %v718_v17 = vrot.slane %v4322_v8, 2  ;;  %v848_v19 = vld [vmem:[#allocation6 + $0xa8] sm:$0xff]  ;;  %v4347_v24 = vld [vmem:[#allocation6 + $0xb0] sm:$0xff] }
  0xde   : > { %3134 = vmatprep.subr.bf16.mxu0 %v5475_v0  ;;  %3183 = vmatprep.subr.bf16.mxu1 %v3182_v26  ;;  %v720_v20 = vrot.slane %v4332_v13, 2  ;;  %v721_v21 = vrot.slane %v4328_v12, 2  ;;  %v4341_v22 = vsel %vm440_vm0, %v445_v63, 0.0  ;;  %v4345_v23 = vsel %vm440_vm0, %v4324_v9, %v448_v10  ;;  %v4349_v25 = vld [vmem:[#allocation6 + $0xb8] sm:$0xff]  ;;  %v4361_v30 = vld [vmem:[#allocation6 + $0xc0] sm:$0xff]  ;;  %v4363_v31 = vld [vmem:[#allocation6 + $0xc8] sm:$0xff] }
  0xdf   : > { %2994 = vmatprep.mubr.f32.mxu1 %v717_v49  ;;  %939 = vmatprep.mubr.f32.mxu0 %v604_v54  ;;  %v4358_v28 = vrot.slane %v382_v14, 7  ;;  %v451_v29 = vrot.slane %v383_v15, 7  ;;  %v384_v32 = vld [vmem:[%s4271_s17 + $0x40] sm:$0xff]  ;;  %v385_v33 = vld [vmem:[%s4271_s17 + $0x48] sm:$0xff]  ;;  %v3153_v35 = vpack.c.bf16 %v848_v19, %v847_v18  ;;  %v723_v38 = vrot.slane %v4341_v22, 2  ;;  %v386_v39 = vld [vmem:[%s4271_s17 + $0x50] sm:$0xff] }
  0xe0   : > { %v387_v41 = vld [vmem:[%s4271_s17 + $0x58] sm:$0xff]  ;;  %v4377_v43 = vld [vmem:[#allocation6 + $0xe0] sm:$0xff]  ;;  %v4379_v44 = vld [vmem:[#allocation6 + $0xe8] sm:$0xff]  ;;  %v722_v46 = vsel %vm714_vm1, %v720_v20, %v721_v21  ;;  %v726_v49 = vrot.slane %v4345_v23, 2  ;;  %v4394_v52 = vrot.slane %v384_v32, 7  ;;  %v454_v53 = vrot.slane %v385_v33, 7 }
  0xe1   : > { %3136 = vmatpush1.bf16.msra.mxu0 %v3135_v27  ;;  %3185 = vmatpush3.bf16.msra.mxu1 %v3182_v26  ;;  %v4353_v26 = vsel %vm440_vm0, 0.0, %v4324_v9  ;;  %v4356_v27 = vsel %vm440_vm0, %v448_v10, 0.0  ;;  %v4375_v42 = vld [vmem:[#allocation6 + $0xd8] sm:$0xff]  ;;  %v4392_v51 = vsel %vm440_vm0, 0.0, %v4358_v28  ;;  %v3156_v54 = vpack.c.bf16 %v4349_v25, %v4347_v24  ;;  %v388_v63 = vld [vmem:[%s4271_s17 + $0x60] sm:$0xff]  ;;  %v389_v5 = vld [vmem:[%s4271_s17 + $0x68] sm:$0xff] }
  0xe2   : > { %3137 = vmatprep.subr.bf16.mxu0 %v5475_v0  ;;  %3187 = vmatprep.subr.bf16.mxu1 %v3186_v36  ;;  %v4400_v55 = vsel %vm440_vm0, %v451_v29, 0.0  ;;  %v4402_v56 = vrot.slane %v386_v39, 7  ;;  %v457_v57 = vrot.slane %v387_v41, 7  ;;  %v724_v61 = vsel %vm714_vm1, %v721_v21, %v723_v38  ;;  %v390_v6 = vld [vmem:[%s4271_s17 + $0x70] sm:$0xff]  ;;  %v4454_v33 = vld [vmem:[#allocation6 + $0xf8] sm:$0xff]  ;;  %vm4608_vm3 = vmneg %vm440_vm0 }
  0xe3   : > { %v605_v1 = vrot.slane %v4322_v8, 1  ;;  %v730_v3 = vrot.slane %v4392_v51, 2  ;;  %v4423_v14 = vsel %vm440_vm0, %v4394_v52, %v454_v53  ;;  %v4427_v8 = vsel %vm440_vm0, 0.0, %v4394_v52  ;;  %v4452_v32 = vld [vmem:[#allocation6 + $0xf0] sm:$0xff] }
  0xe4   : > { %v4431_v15 = vsel %vm440_vm0, %v454_v53, 0.0  ;;  %v4441_v18 = vrot.slane %v388_v63, 7  ;;  %v4444_v19 = vsel %vm440_vm0, %v457_v57, 0.0  ;;  %v460_v20 = vrot.slane %v389_v5, 7 }
  0xe5   : > { %3139 = vmatpush1.bf16.msra.mxu0 %v3138_v37  ;;  %3189 = vmatpush3.bf16.msra.mxu1 %v3186_v36  ;;  %v4367_v36 = vld [vmem:[#allocation6 + $0xd0] sm:$0xff]  ;;  %v719_v37 = vsel %vm714_vm1, %v716_v45, %v718_v17  ;;  %v4388_v45 = vsel %vm440_vm0, %v4358_v28, %v451_v29  ;;  %v4439_v17 = vsel %vm440_vm0, 0.0, %v4402_v56  ;;  %v4446_v21 = vrot.slane %v390_v6, 7 }
  0xe6   : > { %3140 = vmatprep.subr.bf16.mxu0 %v5475_v0  ;;  %3191 = vmatprep.subr.bf16.mxu1 %v3190_v48  ;;  %v731_v4 = vrot.slane %v4388_v45, 2  ;;  %v607_v25 = vrot.slane %v4332_v13, 1  ;;  %v738_v39 = vrot.slane %v4431_v15, 2  ;;  %v392_v13 = vld [vmem:[%s4271_s17 + $0x80] sm:$0xff]  ;;  %v740_v41 = vrot.slane %v4439_v17, 2 }
  0xe7   : > { %5510 = vst [vmem:[#allocation21_spill] sm:$0xff] %v4446_v21  ;;  %v4497_v5 = vsel %vm601_vm2, %v603_v47, %v605_v1 }
  0xe8   : > { %v732_v29 = vsel %vm714_vm1, %v730_v3, %v731_v4  ;;  %v4491_v3 = vrot.slane %v392_v13, 7 }
  0xe9   : > { %3142 = vmatpush1.bf16.msra.mxu0 %v3141_v50  ;;  %3193 = vmatpush3.bf16.msra.mxu1 %v3190_v48  ;;  %v725_v48 = vrot.slane %v4353_v26, 2  ;;  %v728_v50 = vrot.slane %v4356_v27, 2 }
  0xea   : > { %3143 = vmatprep.subr.bf16.mxu0 %v5475_v0  ;;  %3195 = vmatprep.subr.bf16.mxu1 %v3194_v58  ;;  %5511 = vst [vmem:[#allocation22_spill] sm:$0xff] %v4491_v3 }
  0xeb   : > { %v727_v2 = vsel %vm714_vm1, %v725_v48, %v726_v49  ;;  %v729_v10 = vsel %vm714_vm1, %v726_v49, %v728_v50  ;;  %v743_v48 = vrot.slane %v4444_v19, 2  ;;  %v4467_v49 = vsel %vm440_vm0, 0.0, %v4441_v18 }
  0xec   : > { %v4474_v50 = vsel %vm440_vm0, %v460_v20, 0.0 }
  0xed   : > { %3145 = vmatpush1.bf16.msra.mxu0 %v3144_v60  ;;  %3197 = vmatpush3.bf16.msra.mxu1 %v3194_v58  ;;  %v3159_v58 = vpack.c.bf16 %v4363_v31, %v4361_v30  ;;  %v735_v30 = vrot.slane %v4427_v8, 2  ;;  %v736_v31 = vrot.slane %v4423_v14, 2  ;;  %v748_v47 = vrot.slane %v4474_v50, 2 }
  0xee   : > { %3146 = vmatprep.subr.bf16.mxu0 %v5475_v0  ;;  %3199 = vmatprep.subr.bf16.mxu1 %v3198_v7  ;;  %v4524_v60 = vsel %vm440_vm0, 0.0, %v4491_v3 }
  0xf1   : > { %3148 = vmatpush1.bf16.msra.mxu0 %v3147_v11  ;;  %3201 = vmatpush3.bf16.msra.mxu1 %v3198_v7  ;;  %v391_v7 = vld [vmem:[%s4271_s17 + $0x78] sm:$0xff]  ;;  %v733_v11 = vrot.slane %v4400_v55, 2 }
  0xf2   : > { %3149 = vmatprep.subr.bf16.mxu0 %v5475_v0  ;;  %3202 = vmatprep.subr.bf16.mxu1 %v5475_v0  ;;  %v463_v24 = vrot.slane %v391_v7, 7 }
  0xf3   : > { %v734_v38 = vsel %vm714_vm1, %v731_v4, %v733_v11  ;;  %v394_v4 = vld [vmem:[%s4271_s17 + $0x90] sm:$0xff]  ;;  %v4507_v11 = vld [vmem:[%s4271_s17 + $0x98] sm:$0xff] }
  0xf4   : > { %2995 = vmatmul.mubr.f32.vlgmr.msra.gmra.mrb[0].mxu1 %v719_v37  ;;  %v610_v37 = vrot.slane %v4341_v22, 1  ;;  %v4471_v22 = vsel %vm440_vm0, %v4441_v18, %v460_v20  ;;  %v4478_v53 = vsel %vm440_vm0, %v4446_v21, %v463_v24  ;;  %v4488_v63 = vsel %vm440_vm0, %v463_v24, 0.0  ;;  %v396_v20 = vld [vmem:[%s4271_s17 + $0xa0] sm:$0xff]  ;;  %v397_v24 = vld [vmem:[%s4271_s17 + $0xa8] sm:$0xff] }
  0xf5   : > { %3151 = vmatpush1.bf16.msra.mxu0 %v3150_v16  ;;  %2997 = vmatprep.mubr.f32.mxu1 %v722_v46  ;;  %v4435_v16 = vsel %vm440_vm0, %v4402_v56, %v457_v57  ;;  %v753_v57 = vrot.slane %v4488_v63, 2  ;;  %v472_v59 = vrot.slane %v397_v24, 7  ;;  %v755_v24 = vrot.slane %v4524_v60, 2 }
  0xf6   : > { %3152 = vmatprep.subr.bf16.mxu0 %v5475_v0  ;;  %v741_v46 = vrot.slane %v4435_v16, 2 }
  0xf8   : > { %2998 = vmatmul.mubr.f32.gmra.mrb[2].mxu1 %v724_v61  ;;  %v737_v61 = vsel %vm714_vm1, %v735_v30, %v736_v31  ;;  %v399_v30 = vld [vmem:[%s4271_s17 + $0xb8] sm:$0xff]  ;;  %v744_v13 = vsel %vm714_vm1, %v741_v46, %v743_v48 }
  0xf9   : > { %3154 = vmatpush1.bf16.msra.mxu0 %v3153_v35  ;;  %3000 = vmatprep.mubr.f32.mxu1 %v727_v2  ;;  %v608_v35 = vrot.slane %v4328_v12, 1  ;;  %v393_v2 = vld [vmem:[%s4271_s17 + $0x88] sm:$0xff] }
  0xfa   : > { %3155 = vmatprep.subr.bf16.mxu0 %v5475_v0 }
  0xfb   : > { %v4500_v6 = vsel %vm601_vm2, %v607_v25, %v608_v35  ;;  %v4503_v7 = vsel %vm601_vm2, %v608_v35, %v610_v37  ;;  %v751_v25 = vrot.slane %v4478_v53, 2  ;;  %v739_v35 = vsel %vm714_vm1, %v736_v31, %v738_v39 }
  0xfc   : > { %3001 = vmatmul.mubr.f32.gmra.mrb[4].mxu1 %v729_v10  ;;  %v745_v10 = vrot.slane %v4467_v49, 2  ;;  %v742_v37 = vsel %vm714_vm1, %v740_v41, %v741_v46  ;;  %v469_v31 = vrot.slane %v4507_v11, 7  ;;  %v475_v41 = vrot.slane %v399_v30, 7 }
  0xfd   : > { %3157 = vmatpush1.bf16.msra.mxu0 %v3156_v54  ;;  %3003 = vmatprep.mubr.f32.mxu1 %v732_v29  ;;  %v4482_v54 = vsel %vm440_vm0, 0.0, %v4446_v21  ;;  %v398_v29 = vld [vmem:[%s4271_s17 + $0xb0] sm:$0xff]  ;;  %v5513_v21 = vpack.c.bf16 %v4375_v42, %v4367_v36  ;;  %v5516_v46 = vmov 0.0|0.0   ;;  %v754_v42 = vsel %vm714_vm1, %v751_v25, %v753_v57 }
  0xfe   : > { %3158 = vmatprep.subr.bf16.mxu0 %v5475_v0  ;;  %v750_v1 = vrot.slane %v4482_v54, 2  ;;  %v4534_v39 = vrot.slane %v398_v29, 7 }
 0x100   : > { %3004 = vmatmul.mubr.f32.gmra.mrb[6].mxu1 %v734_v38  ;;  %v466_v38 = vrot.slane %v393_v2, 7  ;;  %5515 = vst [vmem:[#allocation25_spill] sm:$0xff] %v4534_v39  ;;  %v4573_v29 = vsel %vm440_vm0, %v4534_v39, %v475_v41  ;;  %v4577_v30 = vsel %vm440_vm0, 0.0, %v4534_v39 }
 0x101   : > { %3160 = vmatpush1.bf16.msra.mxu0 %v3159_v58  ;;  %v746_v58 = vrot.slane %v4471_v22, 2  ;;  %3006 = vmatprep.mubr.f32.mxu1 %v737_v61  ;;  %v4531_v61 = vrot.slane %v394_v4, 7  ;;  %v4550_v4 = vsel %vm440_vm0, %v472_v59, 0.0 }
 0x102   : > { %3161 = vmatprep.subr.bf16.mxu0 %v5475_v0  ;;  %v4526_v0 = vrot.slane %v396_v20, 7  ;;  %v752_v20 = vsel %vm714_vm1, %v750_v1, %v751_v25  ;;  %v4555_v11 = vsel %vm440_vm0, %v4491_v3, %v466_v38  ;;  %v655_v57 = vrot.slane %v4550_v4, 1 }
 0x103   : > { %5514 = vst [vmem:[#allocation24_spill] sm:$0xff] %v4531_v61  ;;  %v747_v48 = vsel %vm714_vm1, %v745_v10, %v746_v58  ;;  %v749_v2 = vsel %vm714_vm1, %v746_v58, %v748_v47  ;;  %5518 = vst [vmem:[#allocation27_spill] sm:$0xff] %v4555_v11  ;;  %v400_v47 = vld [vmem:[%s4271_s17 + $0xc0] sm:$0xff]  ;;  %v5519_v1 = vpack.c.bf16 %v4379_v44, %v4377_v43  ;;  %v756_v39 = vrot.slane %v4555_v11, 2  ;;  %v1764_v11 = vld [vmem:[#allocation11 + $0x10] sm:$0xff] }
 0x104   : > { %5512 = vst [vmem:[#allocation23_spill] sm:$0xff] %v4526_v0  ;;  %3007 = vmatmul.mubr.f32.gmra.mrb[8].mxu1 %v739_v35  ;;  %v4542_v36 = vsel %vm440_vm0, 0.0, %v4526_v0  ;;  %v4569_v25 = vsel %vm440_vm0, %v4531_v61, %v469_v31  ;;  %v401_v35 = vld [vmem:[%s4271_s17 + $0xc8] sm:$0xff] }
 0x105   : > { %3163 = vmatpush1.bf16.msra.mxu0 %v5513_v21  ;;  %3009 = vmatprep.mubr.f32.mxu1 %v742_v37  ;;  %v4547_v21 = vsel %vm440_vm0, %v4526_v0, %v472_v59  ;;  %v652_v10 = vrot.slane %v4542_v36, 1  ;;  %v4565_v59 = vsel %vm440_vm0, %v466_v38, 0.0  ;;  %5521 = vst [vmem:[#allocation29_spill] sm:$0xff] %v4569_v25  ;;  %v4588_v37 = vsel %vm440_vm0, %v475_v41, 0.0 }
 0x106   : > { %3164 = vmatprep.subr.bf16.mxu0 %v5516_v46  ;;  %5517 = vst [vmem:[#allocation26_spill] sm:$0xff] %v4547_v21  ;;  %v653_v58 = vrot.slane %v4547_v21, 1  ;;  %5520 = vst [vmem:[#allocation28_spill] sm:$0xff] %v4565_v59  ;;  %v657_v38 = vrot.slane %v4577_v30, 1  ;;  %v658_v0 = vrot.slane %v4573_v29, 1  ;;  %v4601_v41 = vsel %vm440_vm0, 0.0, %v4531_v61 }
 0x107   : > { %5525 = vst [vmem:[#allocation33_spill] sm:$0xff] %v4601_v41 }
 0x108   : > { %3010 = vmatmul.mubr.f32.gmra.mrb[10].mxu1 %v744_v13  ;;  %v4582_v43 = vsel %vm601_vm2, %v652_v10, %v653_v58  ;;  %v4585_v44 = vsel %vm601_vm2, %v653_v58, %v655_v57  ;;  %v660_v13 = vrot.slane %v4588_v37, 1  ;;  %v4595_v10 = vrot.slane %v400_v47, 7 }
 0x109   : > { %3166 = vmatpush1.bf16.msra.mxu0 %v5519_v1  ;;  %5522 = vst [vmem:[#allocation30_spill] sm:$0xff] %v4582_v43  ;;  %5523 = vst [vmem:[#allocation31_spill] sm:$0xff] %v4585_v44  ;;  %v402_v1 = vld [vmem:[%s4271_s17 + $0xd0] sm:$0xff]  ;;  %3012 = vmatprep.mubr.f32.mxu1 %v747_v48  ;;  %v403_v43 = vld [vmem:[%s4271_s17 + $0xd8] sm:$0xff]  ;;  %v758_v58 = vrot.slane %v4565_v59, 2  ;;  %v761_v57 = vrot.slane %v4569_v25, 2  ;;  %v5526_v44 = vpack.c.bf16 %v4454_v33, %v4452_v32 }
 0x10a   : > { %3167 = vmatprep.subr.bf16.mxu0 %v5516_v46  ;;  %5524 = vst [vmem:[#allocation32_spill] sm:$0xff] %v4595_v10  ;;  %v478_v48 = vrot.slane %v401_v35, 7  ;;  %v4613_v47 = vsel %vm601_vm2, %v657_v38, %v658_v0  ;;  %v4616_v59 = vsel %vm601_vm2, %v658_v0, %v660_v13  ;;  %v4620_v61 = vsel %vm440_vm0, 0.0, %v4595_v10  ;;  %v404_v25 = vld [vmem:[%s4271_s17 + $0xe0] sm:$0xff]  ;;  %v405_v32 = vld [vmem:[%s4271_s17 + $0xe8] sm:$0xff] }
 0x10b   : > { %5529 = vst [vmem:[#allocation34_spill] sm:$0xff] %v4613_v47  ;;  %5530 = vst [vmem:[#allocation35_spill] sm:$0xff] %v4616_v59  ;;  %v4622_v35 = vrot.slane %v402_v1, 7  ;;  %v662_v38 = vrot.slane %v4620_v61, 1  ;;  %v481_v0 = vrot.slane %v403_v43, 7  ;;  %v760_v13 = vrot.slane %v4601_v41, 2 }
 0x10c   : > { %3013 = vmatmul.mubr.f32.gmra.mrb[12].mxu1 %v749_v2  ;;  %v4628_v33 = vsel %vm440_vm0, %v4595_v10, %v478_v48  ;;  %v4636_v59 = vsel %vm440_vm0, %v469_v31, 0.0  ;;  %v757_v10 = vsel %vm714_vm1, %v755_v24, %v756_v39  ;;  %v4645_v47 = vrot.slane %v404_v25, 7 }
 0x10d   : > { %3169 = vmatpush1.bf16.msra.mxu0 %v5526_v44  ;;  %5531 = vst [vmem:[#allocation36_spill] sm:$0xff] %v4622_v35  ;;  %v4631_v44 = vsel %vm440_vm0, %v478_v48, 0.0  ;;  %3015 = vmatprep.mubr.f32.mxu1 %v752_v20  ;;  %5532 = vst [vmem:[#allocation37_spill] sm:$0xff] %v4636_v59  ;;  %v663_v1 = vrot.slane %v4628_v33, 1  ;;  %v612_v48 = vrot.slane %v4353_v26, 1  ;;  %v484_v20 = vrot.slane %v405_v32, 7 }
 0x10e   : > { %v665_v2 = vrot.slane %v4631_v44, 1  ;;  %5533 = vst [vmem:[#allocation38_spill] sm:$0xff] %v4645_v47  ;;  %v763_v26 = vrot.slane %v4636_v59, 2  ;;  %v4662_v24 = vsel %vm440_vm0, %v4622_v35, %v481_v0  ;;  %v759_v32 = vsel %vm714_vm1, %v756_v39, %v758_v58  ;;  %v1762_v58 = vld [vmem:[#allocation11] sm:$0xff] }
 0x10f   : > { %v4650_v43 = vsel %vm601_vm2, %v662_v38, %v663_v1  ;;  %v762_v38 = vsel %vm714_vm1, %v760_v13, %v761_v57  ;;  %v765_v31 = vrot.slane %v4542_v36, 2  ;;  %v4682_v39 = vsel %vm440_vm0, 0.0, %v4645_v47  ;;  %v1763_v13 = vld [vmem:[#allocation11 + $0x8] sm:$0xff] }
 0x110   : > { %2760 = vmatmul.mubr.msk.f32.vlgmr.msra.gmra.mrb[0].mxu0 %vm4608_vm3, %v4296_v34  ;;  %5534 = vst [vmem:[#allocation39_spill] sm:$0xff] %v4650_v43  ;;  %v4653_v41 = vsel %vm601_vm2, %v663_v1, %v665_v2  ;;  %v4657_v34 = vsel %vm440_vm0, 0.0, %v4622_v35  ;;  %3016 = vmatmul.mubr.f32.gmra.mrb[14].mxu1 %v754_v42  ;;  %v668_v1 = vrot.slane %v4662_v24, 1  ;;  %v406_v2 = vld [vmem:[%s4271_s17 + $0xf0] sm:$0xff]  ;;  %v766_v35 = vrot.slane %v4547_v21, 2 }
 0x111   : > { %944 = vmatprep.mubr.f32.mxu0 %v4497_v5  ;;  %5535 = vst [vmem:[#allocation40_spill] sm:$0xff] %v4653_v41  ;;  %v4665_v5 = vsel %vm440_vm0, %v481_v0, 0.0  ;;  %v667_v25 = vrot.slane %v4657_v34, 1  ;;  %3018 = vmatprep.mubr.f32.mxu1 %v757_v10  ;;  %v4678_v0 = vsel %vm440_vm0, %v4645_v47, %v484_v20  ;;  %v407_v10 = vld [vmem:[%s4271_s17 + $0xf8] sm:$0xff]  ;;  %v4693_v36 = vsel %vm440_vm0, %v484_v20, 0.0 }
 0x112   : > { %v670_v42 = vrot.slane %v4665_v5, 1  ;;  %v672_v43 = vrot.slane %v4682_v39, 1  ;;  %v764_v47 = vsel %vm714_vm1, %v761_v57, %v763_v26  ;;  %v768_v21 = vrot.slane %v4550_v4, 2 }
 0x113   : > { %v4687_v41 = vsel %vm601_vm2, %v667_v25, %v668_v1  ;;  %v673_v59 = vrot.slane %v4678_v0, 1  ;;  %v1765_v25 = vld [vmem:[#allocation11 + $0x18] sm:$0xff]  ;;  %v487_v20 = vrot.slane %v407_v10, 7  ;;  %v767_v57 = vsel %vm714_vm1, %v765_v31, %v766_v35  ;;  %v1767_v10 = vld [vmem:[#allocation11 + $0x28] sm:$0xff] }
 0x114   : > { %945 = vmatmul.mubr.f32.gmra.mrb[2].mxu0 %v4300_v40  ;;  %v4690_v40 = vsel %vm601_vm2, %v668_v1, %v670_v42  ;;  %3019 = vmatmul.mubr.f32.gmra.mrb[16].mxu1 %v759_v32  ;;  %v770_v1 = vrot.slane %v4577_v30, 2  ;;  %v4701_v42 = vrot.slane %v406_v2, 7  ;;  %v771_v4 = vrot.slane %v4573_v29, 2 }
 0x115   : > { %949 = vmatprep.mubr.f32.mxu0 %v4500_v6  ;;  %5536 = vst [vmem:[#allocation41_spill] sm:$0xff] %v4690_v40  ;;  %v675_v6 = vrot.slane %v4693_v36, 1  ;;  %3021 = vmatprep.mubr.f32.mxu1 %v762_v38  ;;  %v3203_v40 = vpack.c.bf16 %v1763_v13, %v1762_v58  ;;  %v4709_v26 = vsel %vm601_vm2, %v672_v43, %v673_v59  ;;  %v615_v30 = vrot.slane %v4356_v27, 1 }
 0x116   : > { %v4718_v38 = vsel %vm440_vm0, 0.0, %v4701_v42  ;;  %v5537_v31 = vrot.slane %v4345_v23, 1  ;;  %v4725_v43 = vsel %vm440_vm0, %v4701_v42, %v487_v20  ;;  %v773_v58 = vrot.slane %v4588_v37, 2 }
 0x117   : > { %v4712_v32 = vsel %vm601_vm2, %v673_v59, %v675_v6  ;;  %3204 = vmatpush1.bf16.msra.mxu1 %v3203_v40  ;;  %v4728_v59 = vsel %vm440_vm0, %v487_v20, 0.0  ;;  %v677_v27 = vrot.slane %v4718_v38, 1  ;;  %v772_v13 = vsel %vm714_vm1, %v770_v1, %v771_v4 }
 0x118   : > { %2762 = vmatmul.mubr.msk.f32.gmra.mrb[4].mxu0 %vm4608_vm3, %v4316_v62  ;;  %v3206_v62 = vpack.c.bf16 %v1765_v25, %v1764_v11  ;;  %v614_v2 = vsel %vm601_vm2, %v612_v48, %v5537_v31  ;;  %3022 = vmatmul.mubr.f32.gmra.mrb[18].mxu1 %v764_v47  ;;  %v769_v11 = vsel %vm714_vm1, %v766_v35, %v768_v21  ;;  %v678_v47 = vrot.slane %v4725_v43, 1 }
 0x119   : > { %954 = vmatprep.mubr.f32.mxu0 %v4503_v7  ;;  %3205 = vmatprep.subr.bf16.mxu1 %v5516_v46  ;;  %v1766_v7 = vld [vmem:[#allocation11 + $0x20] sm:$0xff]  ;;  %v680_v48 = vrot.slane %v4728_v59, 1  ;;  %v775_v40 = vrot.slane %v4620_v61, 2  ;;  %v776_v6 = vrot.slane %v4628_v33, 2  ;;  %v5538_v35 = vmov %v5537_v31  ;;  %v1768_v61 = vld [vmem:[#allocation11 + $0x30] sm:$0xff] }
 0x11a   : > { %3024 = vmatprep.mubr.f32.mxu1 %v767_v57  ;;  %v4741_v25 = vsel %vm601_vm2, %v677_v27, %v678_v47  ;;  %v3209_v37 = vpack.c.bf16 %v1767_v10, %v1766_v7  ;;  %v616_v20 = vsel %vm601_vm2, %v5538_v35, %v615_v30  ;;  %v618_v1 = vrot.slane %v4388_v45, 1  ;;  %v1769_v57 = vld [vmem:[#allocation11 + $0x38] sm:$0xff] }
 0x11b   : > { %v4744_v21 = vsel %vm601_vm2, %v678_v47, %v680_v48  ;;  %3207 = vmatpush1.bf16.msra.mxu1 %v3206_v62  ;;  %v774_v31 = vsel %vm714_vm1, %v771_v4, %v773_v58  ;;  %v777_v30 = vsel %vm714_vm1, %v775_v40, %v776_v6  ;;  %v781_v62 = vrot.slane %v4662_v24, 2  ;;  %v1771_v4 = vld [vmem:[#allocation11 + $0x48] sm:$0xff] }
 0x11c   : > { %955 = vmatmul.mubr.f32.gmra.mrb[6].mxu0 %v4328_v12  ;;  %v617_v12 = vrot.slane %v4392_v51, 1  ;;  %3025 = vmatmul.mubr.f32.gmra.mrb[20].mxu1 %v769_v11  ;;  %v780_v51 = vrot.slane %v4657_v34, 2  ;;  %v3212_v27 = vpack.c.bf16 %v1769_v57, %v1768_v61  ;;  %v620_v10 = vrot.slane %v4400_v55, 1  ;;  %v1775_v61 = vld [vmem:[#allocation11 + $0x68] sm:$0xff] }
 0x11d   : > { %959 = vmatprep.mubr.f32.mxu0 %v614_v2  ;;  %3208 = vmatprep.subr.bf16.mxu1 %v5516_v46  ;;  %v778_v2 = vrot.slane %v4631_v44, 2  ;;  %v1770_v44 = vld [vmem:[#allocation11 + $0x40] sm:$0xff]  ;;  %v783_v11 = vrot.slane %v4665_v5, 2  ;;  %v785_v58 = vrot.slane %v4682_v39, 2  ;;  %v786_v47 = vrot.slane %v4678_v0, 2  ;;  %v1772_v5 = vld [vmem:[#allocation11 + $0x50] sm:$0xff] }
 0x11e   : > { %3027 = vmatprep.mubr.f32.mxu1 %v772_v13  ;;  %v619_v7 = vsel %vm601_vm2, %v617_v12, %v618_v1  ;;  %v782_v34 = vsel %vm714_vm1, %v780_v51, %v781_v62  ;;  %v3215_v55 = vpack.c.bf16 %v1771_v4, %v1770_v44  ;;  %v621_v48 = vsel %vm601_vm2, %v618_v1, %v620_v10  ;;  %v5539_v44 = vld [vmem:[#allocation27_spill] sm:$0xff]  ;;  %v5540_v4 = vld [vmem:[#allocation21_spill] sm:$0xff] }
 0x11f   : > { %3210 = vmatpush1.bf16.msra.mxu1 %v3209_v37  ;;  %v622_v13 = vrot.slane %v4427_v8, 1  ;;  %v623_v40 = vrot.slane %v4423_v14, 1  ;;  %v788_v39 = vrot.slane %v4693_v36, 2  ;;  %v787_v37 = vsel %vm714_vm1, %v785_v58, %v786_v47  ;;  %v1774_v36 = vld [vmem:[#allocation11 + $0x60] sm:$0xff] }
 0x120   : > { %2764 = vmatmul.mubr.msk.f32.gmra.mrb[8].mxu0 %vm4608_vm3, %v4324_v9  ;;  %3028 = vmatmul.mubr.f32.gmra.mrb[22].mxu1 %v774_v31  ;;  %v779_v9 = vsel %vm714_vm1, %v776_v6, %v778_v2  ;;  %v784_v6 = vsel %vm714_vm1, %v781_v62, %v783_v11  ;;  %v790_v8 = vrot.slane %v4718_v38, 2  ;;  %v791_v35 = vrot.slane %v4725_v43, 2  ;;  %v5543_v58 = vld [vmem:[#allocation29_spill] sm:$0xff] }
 0x121   : > { %964 = vmatprep.mubr.f32.mxu0 %v616_v20  ;;  %3211 = vmatprep.subr.bf16.mxu1 %v5516_v46  ;;  %v624_v12 = vsel %vm601_vm2, %v622_v13, %v623_v40  ;;  %v625_v1 = vrot.slane %v4431_v15, 1  ;;  %v793_v57 = vrot.slane %v4728_v59, 2  ;;  %v3221_v31 = vpack.c.bf16 %v1775_v61, %v1774_v36  ;;  %v5552_v61 = vld [vmem:[#allocation25_spill] sm:$0xff] }
 0x122   : > { %3030 = vmatprep.mubr.f32.mxu1 %v777_v30  ;;  %v792_v38 = vsel %vm714_vm1, %v790_v8, %v791_v35  ;;  %v627_v15 = vrot.slane %v4439_v17, 1  ;;  %v628_v30 = vrot.slane %v4435_v16, 1  ;;  %v630_v59 = vrot.slane %v4444_v19, 1 }
 0x123   : > { %3213 = vmatpush1.bf16.msra.mxu1 %v3212_v27  ;;  %v626_v2 = vsel %vm601_vm2, %v623_v40, %v625_v1  ;;  %v794_v51 = vsel %vm714_vm1, %v791_v35, %v793_v57  ;;  %v632_v62 = vrot.slane %v4467_v49, 1  ;;  %v633_v27 = vrot.slane %v4471_v22, 1  ;;  %v5546_v40 = vld [vmem:[#allocation24_spill] sm:$0xff]  ;;  %v5550_v35 = vld [vmem:[#allocation26_spill] sm:$0xff] }
 0x124   : > { %965 = vmatmul.mubr.f32.gmra.mrb[10].mxu0 %v4345_v23  ;;  %3031 = vmatmul.mubr.f32.gmra.mrb[24].mxu1 %v779_v9  ;;  %v1773_v23 = vld [vmem:[#allocation11 + $0x58] sm:$0xff]  ;;  %v631_v17 = vsel %vm601_vm2, %v628_v30, %v630_v59  ;;  %v635_v19 = vrot.slane %v4474_v50, 1  ;;  %v638_v49 = vrot.slane %v4478_v53, 1  ;;  %v640_v10 = vrot.slane %v4488_v63, 1  ;;  %v5542_v63 = vld [vmem:[#allocation33_spill] sm:$0xff]  ;;  %v1780_v57 = vld [vmem:[#allocation11 + $0x90] sm:$0xff] }
 0x125   : > { %969 = vmatprep.mubr.f32.mxu0 %v619_v7  ;;  %3214 = vmatprep.subr.bf16.mxu1 %v5516_v46  ;;  %v3218_v20 = vpack.c.bf16 %v1773_v23, %v1772_v5  ;;  %v637_v7 = vrot.slane %v4482_v54, 1  ;;  %v642_v50 = vrot.slane %v4524_v60, 1  ;;  %v643_v54 = vrot.slane %v5539_v44, 1  ;;  %v5541_v9 = vld [vmem:[#allocation28_spill] sm:$0xff]  ;;  %v5547_v5 = vld [vmem:[#allocation30_spill] sm:$0xff]  ;;  %v5548_v23 = vld [vmem:[#allocation23_spill] sm:$0xff] }
 0x126   : > { %3033 = vmatprep.mubr.f32.mxu1 %v782_v34  ;;  %v645_v11 = vrot.slane %v5541_v9, 1  ;;  %v647_v34 = vrot.slane %v5542_v63, 1  ;;  %v648_v60 = vrot.slane %v5543_v58, 1  ;;  %v1779_v1 = vld [vmem:[#allocation11 + $0x88] sm:$0xff] }
 0x127   : > { %3216 = vmatpush1.bf16.msra.mxu1 %v3215_v55  ;;  %v1795_v59 = vld [vmem:[#allocation11 + $0x108] sm:$0xff] }
 0x128   : > { %2766 = vmatmul.mubr.msk.f32.gmra.mrb[12].mxu0 %vm4608_vm3, %v4358_v28  ;;  %3034 = vmatmul.mubr.f32.gmra.mrb[26].mxu1 %v784_v6  ;;  %v789_v28 = vsel %vm714_vm1, %v786_v47, %v788_v39  ;;  %v5544_v47 = vld [vmem:[#allocation22_spill] sm:$0xff]  ;;  %v649_v55 = vsel %vm601_vm2, %v647_v34, %v648_v60  ;;  %v5549_v6 = vld [vmem:[#allocation31_spill] sm:$0xff]  ;;  %v1790_v34 = vld [vmem:[#allocation11 + $0xe0] sm:$0xff] }
 0x129   : > { %974 = vmatprep.mubr.f32.mxu0 %v621_v48  ;;  %3217 = vmatprep.subr.bf16.mxu1 %v5516_v46  ;;  %v5545_v48 = vld [vmem:[#allocation37_spill] sm:$0xff]  ;;  %v1776_v39 = vld [vmem:[#allocation11 + $0x70] sm:$0xff] }
 0x12a   : > { %3036 = vmatprep.mubr.f32.mxu1 %v787_v37  ;;  %v650_v13 = vrot.slane %v5545_v48, 1  ;;  %v1777_v37 = vld [vmem:[#allocation11 + $0x78] sm:$0xff]  ;;  %v5559_v48 = vld [vmem:[#allocation38_spill] sm:$0xff] }
 0x12b   : > { %3219 = vmatpush1.bf16.msra.mxu1 %v3218_v20  ;;  %v3224_v8 = vpack.c.bf16 %v1777_v37, %v1776_v39  ;;  %v5551_v20 = vld [vmem:[#allocation34_spill] sm:$0xff] }
 0x12c   : > { %975 = vmatmul.mubr.f32.gmra.mrb[14].mxu0 %v4388_v45  ;;  %3037 = vmatmul.mubr.f32.gmra.mrb[28].mxu1 %v789_v28  ;;  %v629_v45 = vsel %vm601_vm2, %v627_v15, %v628_v30  ;;  %v5553_v28 = vld [vmem:[#allocation35_spill] sm:$0xff]  ;;  %v1782_v15 = vld [vmem:[#allocation11 + $0xa0] sm:$0xff]  ;;  %v1783_v30 = vld [vmem:[#allocation11 + $0xa8] sm:$0xff] }
 0x12d   : > { %979 = vmatprep.mubr.f32.mxu0 %v624_v12  ;;  %3220 = vmatprep.subr.bf16.mxu1 %v5516_v46  ;;  %v1778_v12 = vld [vmem:[#allocation11 + $0x80] sm:$0xff] }
 0x12e   : > { %3039 = vmatprep.mubr.f32.mxu1 %v792_v38  ;;  %v3227_v36 = vpack.c.bf16 %v1779_v1, %v1778_v12  ;;  %v1781_v38 = vld [vmem:[#allocation11 + $0x98] sm:$0xff] }
 0x12f   : > { %3222 = vmatpush1.bf16.msra.mxu1 %v3221_v31  ;;  %v3230_v31 = vpack.c.bf16 %v1781_v38, %v1780_v57 }
 0x130   : > { %2768 = vmatmul.mubr.msk.f32.gmra.mrb[16].mxu0 %vm4608_vm3, %v4394_v52  ;;  %3040 = vmatmul.mubr.f32.gmra.mrb[30].mxu1 %v794_v51  ;;  %v634_v52 = vsel %vm601_vm2, %v632_v62, %v633_v27  ;;  %v3233_v51 = vpack.c.bf16 %v1783_v30, %v1782_v15  ;;  %v4936_v30 = vld [vmem:[#allocation9] ss:$0 sm:$0xff] }
 0x131   : > { %984 = vmatprep.mubr.f32.mxu0 %v626_v2  ;;  %3223 = vmatprep.subr.bf16.mxu1 %v5516_v46  ;;  %v5554_v2 = vld [vmem:[#allocation39_spill] sm:$0xff] }
 0x133   : > { %3225 = vmatpush1.bf16.msra.mxu1 %v3224_v8 }
 0x134   : > { %985 = vmatmul.mubr.f32.gmra.mrb[18].mxu0 %v4423_v14  ;;  %v636_v14 = vsel %vm601_vm2, %v633_v27, %v635_v19  ;;  %3226 = vmatprep.subr.bf16.mxu1 %v5516_v46  ;;  %v5556_v27 = vld [vmem:[#allocation40_spill] sm:$0xff] }
 0x135   : > { %989 = vmatprep.mubr.f32.mxu0 %v629_v45  ;;  %v1794_v45 = vld [vmem:[#allocation11 + $0x100] sm:$0xff] }
 0x136   : > { %v4860_v62 = vpack.c.bf16 %v1795_v59, %v1794_v45 }
 0x137   : > { %3228 = vmatpush1.bf16.msra.mxu1 %v3227_v36 }
 0x138   : > { %2770 = vmatmul.mubr.msk.f32.gmra.mrb[20].mxu0 %vm4608_vm3, %v4402_v56  ;;  %v639_v56 = vsel %vm601_vm2, %v637_v7, %v638_v49  ;;  %3229 = vmatprep.subr.bf16.mxu1 %v5516_v46  ;;  %v1797_v7 = vld [vmem:[#allocation11 + $0x118] sm:$0xff] }
 0x139   : > { %994 = vmatprep.mubr.f32.mxu0 %v631_v17  ;;  %v5555_v17 = vld [vmem:[#allocation32_spill] sm:$0xff]  ;;  %3251 = vmatprep.subr.bf16.mxu0 %v4860_v62 }
 0x13a   : > { %3253 = vmatpush3.bf16.msra.mxu0 %v4860_v62 }
 0x13b   : > { %3231 = vmatpush1.bf16.msra.mxu1 %v3230_v31  ;;  %v4934_v31 = vld [vmem:[#allocation8] ss:$0 sm:$0xff] }
 0x13c   : > { %995 = vmatmul.mubr.f32.gmra.mrb[22].mxu0 %v4435_v16  ;;  %v641_v16 = vsel %vm601_vm2, %v638_v49, %v640_v10  ;;  %3232 = vmatprep.subr.bf16.mxu1 %v5516_v46  ;;  %v1787_v10 = vld [vmem:[#allocation11 + $0xc8] sm:$0xff] }
 0x13d   : > { %999 = vmatprep.mubr.f32.mxu0 %v634_v52  ;;  %v1785_v52 = vld [vmem:[#allocation11 + $0xb8] sm:$0xff] }
 0x13f   : > { %3234 = vmatpush1.bf16.msra.mxu1 %v3233_v51 }
 0x140   : > { %2772 = vmatmul.mubr.msk.f32.gmra.mrb[24].mxu0 %vm4608_vm3, %v4441_v18  ;;  %v644_v18 = vsel %vm601_vm2, %v642_v50, %v643_v54  ;;  %3235 = vmatprep.subr.bf16.mxu1 %v5516_v46  ;;  %v1798_v50 = vld [vmem:[#allocation11 + $0x120] sm:$0xff] }
 0x141   : > { %1004 = vmatprep.mubr.f32.mxu0 %v636_v14  ;;  %v1796_v14 = vld [vmem:[#allocation11 + $0x110] sm:$0xff] }
 0x142   : > { %v4867_v49 = vpack.c.bf16 %v1797_v7, %v1796_v14 }
 0x144   : > { %1005 = vmatmul.mubr.f32.gmra.mrb[26].mxu0 %v4471_v22  ;;  %v646_v22 = vsel %vm601_vm2, %v643_v54, %v645_v11  ;;  %3255 = vmatprep.subr.bf16.mxu0 %v4867_v49  ;;  %v5557_v54 = vld [vmem:[#allocation36_spill] sm:$0xff]  ;;  %v1800_v11 = vld [vmem:[#allocation11 + $0x130] sm:$0xff] }
 0x145   : > { %1009 = vmatprep.mubr.f32.mxu0 %v639_v56  ;;  %v1786_v56 = vld [vmem:[#allocation11 + $0xc0] sm:$0xff]  ;;  %3257 = vmatpush3.bf16.msra.mxu0 %v4867_v49 }
 0x148   : > { %2774 = vmatmul.mubr.msk.f32.gmra.mrb[28].mxu0 %vm4608_vm3, %v5540_v4  ;;  %v5558_v4 = vld [vmem:[#allocation41_spill] sm:$0xff] }
 0x149   : > { %1014 = vmatprep.mubr.f32.mxu0 %v641_v16  ;;  %v3239_v16 = vpack.c.bf16 %v1787_v10, %v1786_v56 }
 0x14c   : > { %1015 = vmatmul.mubr.f32.gmra.mrb[30].mxu0 %v4478_v53  ;;  %v651_v53 = vsel %vm601_vm2, %v648_v60, %v650_v13  ;;  %v1793_v13 = vld [vmem:[#allocation11 + $0xf8] sm:$0xff] }
 0x14d   : > { %1019 = vmatprep.mubr.f32.mxu0 %v644_v18  ;;  %v1789_v18 = vld [vmem:[#allocation11 + $0xd8] sm:$0xff] }
 0x150   : > { %2776 = vmatmul.mubr.msk.f32.gmra.mrb[32].mxu0 %vm4608_vm3, %v5544_v47  ;;  %v1802_v47 = vld [vmem:[#allocation11 + $0x140] sm:$0xff] }
 0x151   : > { %1024 = vmatprep.mubr.f32.mxu0 %v646_v22  ;;  %v1801_v22 = vld [vmem:[#allocation11 + $0x138] sm:$0xff] }
 0x152   : > { %v4883_v63 = vpack.c.bf16 %v1801_v22, %v1800_v11 }
 0x154   : > { %1025 = vmatmul.mubr.f32.gmra.mrb[34].mxu0 %v5539_v44  ;;  %v1799_v44 = vld [vmem:[#allocation11 + $0x128] sm:$0xff] }
 0x155   : > { %1029 = vmatprep.mubr.f32.mxu0 %v649_v55  ;;  %v1803_v55 = vld [vmem:[#allocation11 + $0x148] sm:$0xff] }
 0x158   : > { %2778 = vmatmul.mubr.msk.f32.gmra.mrb[36].mxu0 %vm4608_vm3, %v5546_v40  ;;  %v1804_v40 = vld [vmem:[#allocation11 + $0x150] sm:$0xff] }
 0x159   : > { %1034 = vmatprep.mubr.f32.mxu0 %v651_v53 }
 0x15c   : > { %1035 = vmatmul.mubr.f32.gmra.mrb[38].mxu0 %v5543_v58  ;;  %v1791_v58 = vld [vmem:[#allocation11 + $0xe8] sm:$0xff] }
 0x15d   : > { %1039 = vmatprep.mubr.f32.mxu0 %v5547_v5  ;;  %v3245_v60 = vpack.c.bf16 %v1791_v58, %v1790_v34  ;;  %v1805_v5 = vld [vmem:[#allocation11 + $0x158] sm:$0xff] }
 0x160   : > { %2780 = vmatmul.mubr.msk.f32.gmra.mrb[40].mxu0 %vm4608_vm3, %v5548_v23  ;;  %v4899_v23 = vpack.c.bf16 %v1805_v5, %v1804_v40 }
 0x161   : > { %1044 = vmatprep.mubr.f32.mxu0 %v5549_v6 }
 0x164   : > { %1045 = vmatmul.mubr.f32.gmra.mrb[42].mxu0 %v5550_v35 }
 0x165   : > { %1049 = vmatprep.mubr.f32.mxu0 %v5551_v20 }
 0x168   : > { %2782 = vmatmul.mubr.msk.f32.gmra.mrb[44].mxu0 %vm4608_vm3, %v5552_v61 }
 0x169   : > { %1054 = vmatprep.mubr.f32.mxu0 %v5553_v28 }
 0x16c   : > { %1055 = vmatmul.mubr.f32.gmra.mrb[46].mxu0 %v4573_v29  ;;  %v1784_v29 = vld [vmem:[#allocation11 + $0xb0] sm:$0xff] }
 0x16d   : > { %1059 = vmatprep.mubr.f32.mxu0 %v5554_v2  ;;  %v3236_v19 = vpack.c.bf16 %v1785_v52, %v1784_v29 }
 0x16f   : > { %3237 = vmatpush1.bf16.msra.mxu1 %v3236_v19 }
 0x170   : > { %2784 = vmatmul.mubr.msk.f32.gmra.mrb[48].mxu0 %vm4608_vm3, %v5555_v17  ;;  %3238 = vmatprep.subr.bf16.mxu1 %v5516_v46 }
 0x171   : > { %1064 = vmatprep.mubr.f32.mxu0 %v5556_v27 }
 0x173   : > { %3240 = vmatpush1.bf16.msra.mxu1 %v3239_v16 }
 0x174   : > { %1065 = vmatmul.mubr.f32.gmra.mrb[50].mxu0 %v4628_v33  ;;  %v4876_v33 = vpack.c.bf16 %v1799_v44, %v1798_v50  ;;  %3241 = vmatprep.subr.bf16.mxu1 %v5516_v46 }
 0x175   : > { %1069 = vmatprep.mubr.f32.mxu0 %v4687_v41  ;;  %v1788_v41 = vld [vmem:[#allocation11 + $0xd0] sm:$0xff] }
 0x176   : > { %3259 = vmatprep.subr.bf16.mxu0 %v4876_v33  ;;  %v3242_v9 = vpack.c.bf16 %v1789_v18, %v1788_v41 }
 0x177   : > { %3261 = vmatpush3.bf16.msra.mxu0 %v4876_v33 }
 0x178   : > { %2786 = vmatmul.mubr.msk.f32.gmra.mrb[52].mxu0 %vm4608_vm3, %v5557_v54  ;;  %3243 = vmatpush1.bf16.msra.mxu1 %v3242_v9 }
 0x179   : > { %1074 = vmatprep.mubr.f32.mxu0 %v5558_v4  ;;  %3244 = vmatprep.subr.bf16.mxu1 %v5516_v46 }
 0x17a   : > { %3263 = vmatprep.subr.bf16.mxu0 %v4883_v63 }
 0x17b   : > { %3265 = vmatpush3.bf16.msra.mxu0 %v4883_v63 }
 0x17c   : > { %1075 = vmatmul.mubr.f32.gmra.mrb[54].mxu0 %v4662_v24  ;;  %3246 = vmatpush1.bf16.msra.mxu1 %v3245_v60  ;;  %v4892_v24 = vpack.c.bf16 %v1803_v55, %v1802_v47 }
 0x17d   : > { %1079 = vmatprep.mubr.f32.mxu0 %v4709_v26  ;;  %3247 = vmatprep.subr.bf16.mxu1 %v5516_v46  ;;  %v1792_v26 = vld [vmem:[#allocation11 + $0xf0] sm:$0xff]  ;;  %v1806_v46 = vld [vmem:[#allocation11 + $0x160] sm:$0xff] }
 0x17e   : > { %3267 = vmatprep.subr.bf16.mxu0 %v4892_v24  ;;  %v3248_v53 = vpack.c.bf16 %v1793_v13, %v1792_v26 }
 0x17f   : > { %3269 = vmatpush3.bf16.msra.mxu0 %v4892_v24 }
 0x180   : > { %2788 = vmatmul.mubr.msk.f32.gmra.mrb[56].mxu0 %vm4608_vm3, %v5559_v48  ;;  %3249 = vmatpush1.bf16.msra.mxu1 %v3248_v53 }
 0x181   : > { %1084 = vmatprep.mubr.f32.mxu0 %v4712_v32  ;;  %3282 = vmatprep.subr.bf16.mxu1 %v4860_v62  ;;  %v1807_v32 = vld [vmem:[#allocation11 + $0x168] sm:$0xff] }
 0x182   : > { %3271 = vmatprep.subr.bf16.mxu0 %v4899_v23  ;;  %v4908_v6 = vpack.c.bf16 %v1807_v32, %v1806_v46 }
 0x183   : > { %3273 = vmatpush3.bf16.msra.mxu0 %v4899_v23 }
 0x184   : > { %1085 = vmatmul.mubr.f32.gmra.mrb[58].mxu0 %v4678_v0  ;;  %3275 = vmatprep.subr.bf16.mxu0 %v4908_v6  ;;  %v1808_v0 = vld [vmem:[#allocation11 + $0x170] sm:$0xff] }
 0x185   : > { %1089 = vmatprep.mubr.f32.mxu0 %v4741_v25  ;;  %v1809_v25 = vld [vmem:[#allocation11 + $0x178] sm:$0xff] }
 0x186   : > { %v4914_v39 = vpack.c.bf16 %v1809_v25, %v1808_v0 }
 0x187   : > { %3277 = vmatpush3.bf16.msra.mxu0 %v4908_v6 }
 0x188   : > { %2790 = vmatmul.mubr.msk.f32.gmra.mrb[60].mxu0 %vm4608_vm3, %v4701_v42  ;;  %3279 = vmatprep.subr.bf16.mxu0 %v4914_v39 }
 0x189   : > { %1094 = vmatprep.mubr.f32.mxu0 %v4744_v21 }
 0x18b   : > { %3281 = vmatpush3.bf16.msra.mxu0 %v4914_v39 }
 0x18c   : > { %1095 = vmatmul.mubr.f32.gmra.mrb[62].mxu0 %v4725_v43 }
 0x1c7   : > { %v2996_v3 = vpop.f32.mrb[0].mxu1 }
 0x1c8   : > { %v1166_v42 = vpop.f32.mrb[1].mxu1 }
 0x1cb   : > { %v2999_v37 = vpop.f32.mrb[2].mxu1 }
 0x1cc   : > { %v1176_v8 = vpop.f32.mrb[3].mxu1 }
 0x1cf   : > { %v3002_v35 = vpop.f32.mrb[4].mxu1 }
 0x1d0   : > { %v1186_v21 = vpop.f32.mrb[5].mxu1 }
 0x1d3   : > { %v4918_v20 = vpop.f32.mrb[6].mxu1 }
 0x1d4   : > { %v4920_v12 = vpop.f32.mrb[7].mxu1 }
 0x1d7   : > { %v4922_v1 = vpop.f32.mrb[8].mxu1 }
 0x1d8   : > { %v4924_v36 = vpop.f32.mrb[9].mxu1 }
 0x1db   : > { %v4926_v43 = vpop.f32.mrb[10].mxu1 }
 0x1dc   : > { %v4928_v61 = vpop.f32.mrb[11].mxu1 }
 0x1df   : > { %v4930_v28 = vpop.f32.mrb[12].mxu1 }
 0x1e0   : > { %v4932_v57 = vpop.f32.mrb[13].mxu1 }
 0x1e3   : > { %v941_v38 = vpop.f32.mrb[0].mxu0  ;;  %v4938_v51 = vpop.f32.mrb[14].mxu1 }
 0x1e4   : > { %v1167_v2 = vadd.f32 %v1166_v42, %v941_v38  ;;  %v943_v15 = vpop.f32.mrb[1].mxu0  ;;  %v4941_v59 = vpop.f32.mrb[15].mxu1 }
 0x1e6   : > { %v1332_v45 = vmul.f32 %v4934_v31, %v1167_v2 }
 0x1e7   : > { %v946_v17 = vpop.f32.mrb[2].mxu0  ;;  %v4946_v19 = vpop.f32.mrb[16].mxu1 }
 0x1e8   : > { %v4944_v27 = vadd.f32 %v4936_v30, %v1332_v45  ;;  %v1172_v29 = vadd.f32 %v2996_v3, %v946_v17  ;;  %v948_v52 = vpop.f32.mrb[3].mxu0  ;;  %v4950_v56 = vpop.f32.mrb[17].mxu1 }
 0x1ea   : > { %v2793_v14 = vmul.f32 -1.442695, %v4944_v27  ;;  %v1333_v7 = vmul.f32 %v4934_v31, %v1172_v29 }
 0x1eb   : > { %v951_v10 = vpop.f32.mrb[4].mxu0  ;;  %v4955_v54 = vpop.f32.mrb[18].mxu1 }
 0x1ec   : > { %3411 = vpow2.f32 %v2793_v14  ;;  %v4953_v16 = vadd.f32 %v4936_v30, %v1333_v7  ;;  %v1177_v50 = vadd.f32 %v1176_v8, %v951_v10  ;;  %v953_v44 = vpop.f32.mrb[5].mxu0  ;;  %v4959_v18 = vpop.f32.mrb[19].mxu1 }
 0x1ee   : > { %v2794_v4 = vmul.f32 -1.442695, %v4953_v16  ;;  %v1334_v41 = vmul.f32 %v4934_v31, %v1177_v50 }
 0x1ef   : > { %v956_v9 = vpop.f32.mrb[6].mxu0  ;;  %v4964_v58 = vpop.f32.mrb[20].mxu1 }
 0x1f0   : > { %3413 = vpow2.f32 %v2794_v4  ;;  %v4962_v11 = vadd.f32 %v4936_v30, %v1334_v41  ;;  %v1182_v22 = vadd.f32 %v2999_v37, %v956_v9  ;;  %v958_v34 = vpop.f32.mrb[7].mxu0  ;;  %v4968_v55 = vpop.f32.mrb[21].mxu1 }
 0x1f2   : > { %v2795_v60 = vmul.f32 -1.442695, %v4962_v11  ;;  %v1335_v47 = vmul.f32 %v4934_v31, %v1182_v22 }
 0x1f3   : > { %v961_v48 = vpop.f32.mrb[8].mxu0  ;;  %v4973_v40 = vpop.f32.mrb[22].mxu1 }
 0x1f4   : > { %3415 = vpow2.f32 %v2795_v60  ;;  %v4971_v26 = vadd.f32 %v4936_v30, %v1335_v47  ;;  %v1187_v13 = vadd.f32 %v1186_v21, %v961_v48  ;;  %v963_v53 = vpop.f32.mrb[9].mxu0  ;;  %v4977_v0 = vpop.f32.mrb[23].mxu1 }
 0x1f6   : > { %v3412_v5 = vpop.eup %3411  ;;  %v2796_v46 = vmul.f32 -1.442695, %v4971_v26  ;;  %v1336_v32 = vmul.f32 %v4934_v31, %v1187_v13 }
 0x1f7   : > { %v1499_v25 = vadd.f32 1.0, %v3412_v5  ;;  %v966_v3 = vpop.f32.mrb[10].mxu0  ;;  %v4982_v21 = vpop.f32.mrb[24].mxu1 }
 0x1f8   : > { %3417 = vpow2.f32 %v2796_v46  ;;  %v4980_v42 = vadd.f32 %v4936_v30, %v1336_v32  ;;  %v1192_v37 = vadd.f32 %v3002_v35, %v966_v3  ;;  %v968_v8 = vpop.f32.mrb[11].mxu0  ;;  %v4986_v45 = vpop.f32.mrb[25].mxu1 }
 0x1f9   : > { %3419 = vrcp.f32 %v1499_v25 }
 0x1fa   : > { %v3414_v38 = vpop.eup %3413  ;;  %v2797_v2 = vmul.f32 -1.442695, %v4980_v42  ;;  %v1337_v15 = vmul.f32 %v4934_v31, %v1192_v37 }
 0x1fb   : > { %v1500_v17 = vadd.f32 1.0, %v3414_v38  ;;  %v971_v29 = vpop.f32.mrb[12].mxu0  ;;  %v4992_v7 = vpop.f32.mrb[26].mxu1 }
 0x1fc   : > { %3421 = vpow2.f32 %v2797_v2  ;;  %v4989_v52 = vadd.f32 %v4936_v30, %v1337_v15  ;;  %v1197_v14 = vadd.f32 %v4920_v12, %v971_v29  ;;  %v973_v35 = vpop.f32.mrb[13].mxu0  ;;  %v4996_v4 = vpop.f32.mrb[27].mxu1 }
 0x1fd   : > { %3423 = vrcp.f32 %v1500_v17 }
 0x1fe   : > { %v3416_v10 = vpop.eup %3415  ;;  %v2798_v50 = vmul.f32 -1.442695, %v4989_v52  ;;  %v1338_v44 = vmul.f32 %v4934_v31, %v1197_v14 }
 0x1ff   : > { %v1501_v41 = vadd.f32 1.0, %v3416_v10  ;;  %v976_v9 = vpop.f32.mrb[14].mxu0  ;;  %v5002_v60 = vpop.f32.mrb[28].mxu1  ;;  %v3955_v10 = vmov 0.0  }
 0x200   : > { %3425 = vpow2.f32 %v2798_v50  ;;  %v4999_v22 = vadd.f32 %v4936_v30, %v1338_v44  ;;  %v1202_v34 = vadd.f32 %v4918_v20, %v976_v9  ;;  %v978_v12 = vpop.f32.mrb[15].mxu0  ;;  %v5006_v53 = vpop.f32.mrb[29].mxu1 }
 0x201   : > { %3427 = vrcp.f32 %v1501_v41 }
 0x202   : > { %v3418_v47 = vpop.eup %3417  ;;  %v2799_v48 = vmul.f32 -1.442695, %v4999_v22  ;;  %v1339_v13 = vmul.f32 %v4934_v31, %v1202_v34 }
 0x203   : > { %v3420_v5 = vpop.eup %3419  ;;  %v1502_v46 = vadd.f32 1.0, %v3418_v47  ;;  %v981_v32 = vpop.f32.mrb[16].mxu0 }
 0x204   : > { %3429 = vpow2.f32 %v2799_v48  ;;  %v5009_v25 = vadd.f32 %v4936_v30, %v1339_v13  ;;  %v1207_v20 = vadd.f32 %v4924_v36, %v981_v32  ;;  %v983_v3 = vpop.f32.mrb[17].mxu0  ;;  %v1595_v37 = vmul.f32 %v3420_v5, %v4944_v27  ;;  %v5013_v8 = vpop.f32.mrb[30].mxu1 }
 0x205   : > { %3431 = vrcp.f32 %v1502_v46  ;;  %v5017_v17 = vpop.f32.mrb[31].mxu1 }
 0x206   : > { %v3422_v38 = vpop.eup %3421  ;;  %v2800_v2 = vmul.f32 -1.442695, %v5009_v25  ;;  %v1340_v15 = vmul.f32 %v4934_v31, %v1207_v20  ;;  %1874 = vmatprep.mubr.f32.mxu1 %v1595_v37 }
 0x207   : > { %v3424_v29 = vpop.eup %3423  ;;  %v1503_v14 = vadd.f32 1.0, %v3422_v38  ;;  %v986_v35 = vpop.f32.mrb[18].mxu0  ;;  %1875 = vmatmul.mubr.f32.vlgmr.msra.gmra.mrb[32].mxu1 %v3955_v10 }
 0x208   : > { %3433 = vpow2.f32 %v2800_v2  ;;  %v5021_v36 = vadd.f32 %v4936_v30, %v1340_v15  ;;  %v1212_v27 = vadd.f32 %v4922_v1, %v986_v35  ;;  %3290 = vmatpush3.bf16.msra.mxu1 %v4860_v62  ;;  %v988_v50 = vpop.f32.mrb[19].mxu0  ;;  %v1596_v44 = vmul.f32 %v3424_v29, %v4953_v16 }
 0x209   : > { %3435 = vrcp.f32 %v1503_v14  ;;  %3283 = vmatprep.subr.bf16.mxu1 %v4867_v49 }
 0x20a   : > { %v3426_v41 = vpop.eup %3425  ;;  %v2801_v9 = vmul.f32 -1.442695, %v5021_v36  ;;  %v1341_v34 = vmul.f32 %v4934_v31, %v1212_v27  ;;  %1879 = vmatprep.mubr.f32.mxu1 %v1596_v44 }
 0x20b   : > { %v3428_v12 = vpop.eup %3427  ;;  %v1504_v47 = vadd.f32 1.0, %v3426_v41  ;;  %v991_v48 = vpop.f32.mrb[20].mxu0  ;;  %1880 = vmatmul.mubr.f32.gmra.mrb[34].mxu1 %v3955_v10 }
 0x20c   : > { %3437 = vpow2.f32 %v2801_v9  ;;  %v5031_v62 = vadd.f32 %v4936_v30, %v1341_v34  ;;  %v1217_v1 = vadd.f32 %v4928_v61, %v991_v48  ;;  %v993_v16 = vpop.f32.mrb[21].mxu0  ;;  %v1597_v13 = vmul.f32 %v3428_v12, %v4962_v11  ;;  %3291 = vmatpush3.bf16.msra.mxu1 %v4867_v49 }
 0x20d   : > { %3439 = vrcp.f32 %v1504_v47  ;;  %3284 = vmatprep.subr.bf16.mxu1 %v4876_v33 }
 0x20e   : > { %v3430_v5 = vpop.eup %3429  ;;  %v2802_v46 = vmul.f32 -1.442695, %v5031_v62  ;;  %v1342_v32 = vmul.f32 %v4934_v31, %v1217_v1  ;;  %1884 = vmatprep.mubr.f32.mxu1 %v1597_v13  ;;  %3074 = vmatprep.mubr.f32.mxu0 %v1597_v13 }
 0x20f   : > { %v3432_v20 = vpop.eup %3431  ;;  %v1505_v3 = vadd.f32 1.0, %v3430_v5  ;;  %v996_v38 = vpop.f32.mrb[22].mxu0  ;;  %1885 = vmatmul.mubr.f32.gmra.mrb[36].mxu1 %v1595_v37 }
 0x210   : > { %3441 = vpow2.f32 %v2802_v46  ;;  %v5040_v61 = vadd.f32 %v4936_v30, %v1342_v32  ;;  %v1222_v49 = vadd.f32 %v4926_v43, %v996_v38  ;;  %v998_v11 = vpop.f32.mrb[23].mxu0  ;;  %v1598_v2 = vmul.f32 %v3432_v20, %v4971_v26  ;;  %3292 = vmatpush3.bf16.msra.mxu1 %v4876_v33 }
 0x211   : > { %3443 = vrcp.f32 %v1505_v3  ;;  %3285 = vmatprep.subr.bf16.mxu1 %v4883_v63 }
 0x212   : > { %v3434_v15 = vpop.eup %3433  ;;  %v2803_v29 = vmul.f32 -1.442695, %v5040_v61  ;;  %v1343_v14 = vmul.f32 %v4934_v31, %v1222_v49  ;;  %1889 = vmatprep.mubr.f32.mxu1 %v1598_v2  ;;  %3075 = vmatmul.mubr.f32.vlgmr.msra.gmra.mrb[64].mxu0 %v1598_v2 }
 0x213   : > { %v3436_v37 = vpop.eup %3435  ;;  %v1506_v35 = vadd.f32 1.0, %v3434_v15  ;;  %v1001_v27 = vpop.f32.mrb[24].mxu0  ;;  %1890 = vmatmul.mubr.f32.gmra.mrb[38].mxu1 %v1596_v44 }
 0x214   : > { %3445 = vpow2.f32 %v2803_v29  ;;  %v5049_v43 = vadd.f32 %v4936_v30, %v1343_v14  ;;  %v1227_v33 = vadd.f32 %v4932_v57, %v1001_v27  ;;  %v1003_v26 = vpop.f32.mrb[25].mxu0  ;;  %v1599_v50 = vmul.f32 %v3436_v37, %v4980_v42  ;;  %3293 = vmatpush3.bf16.msra.mxu1 %v4883_v63 }
 0x215   : > { %3447 = vrcp.f32 %v1506_v35  ;;  %3286 = vmatprep.subr.bf16.mxu1 %v4892_v24 }
 0x216   : > { %v3438_v41 = vpop.eup %3437  ;;  %v2804_v9 = vmul.f32 -1.442695, %v5049_v43  ;;  %v1344_v34 = vmul.f32 %v4934_v31, %v1227_v33  ;;  %1894 = vmatprep.mubr.f32.mxu1 %v1599_v50  ;;  %3077 = vmatprep.mubr.f32.mxu0 %v1599_v50 }
 0x217   : > { %v3440_v44 = vpop.eup %3439  ;;  %v1507_v12 = vadd.f32 1.0, %v3438_v41  ;;  %v1006_v47 = vpop.f32.mrb[26].mxu0  ;;  %1895 = vmatmul.mubr.f32.gmra.mrb[40].mxu1 %v1597_v13 }
 0x218   : > { %3449 = vpow2.f32 %v2804_v9  ;;  %v5058_v57 = vadd.f32 %v4936_v30, %v1344_v34  ;;  %v1232_v63 = vadd.f32 %v4930_v28, %v1006_v47  ;;  %v1008_v42 = vpop.f32.mrb[27].mxu0  ;;  %v1600_v48 = vmul.f32 %v3440_v44, %v4989_v52  ;;  %3294 = vmatpush3.bf16.msra.mxu1 %v4892_v24 }
 0x219   : > { %3451 = vrcp.f32 %v1507_v12  ;;  %3287 = vmatprep.subr.bf16.mxu1 %v4899_v23 }
 0x21a   : > { %v3442_v1 = vpop.eup %3441  ;;  %v2805_v16 = vmul.f32 -1.442695, %v5058_v57  ;;  %v1345_v5 = vmul.f32 %v4934_v31, %v1232_v63  ;;  %1899 = vmatprep.mubr.f32.mxu1 %v1600_v48  ;;  %3078 = vmatmul.mubr.f32.gmra.mrb[66].mxu0 %v1600_v48 }
 0x21b   : > { %v3444_v13 = vpop.eup %3443  ;;  %v1508_v46 = vadd.f32 1.0, %v3442_v1  ;;  %v1011_v32 = vpop.f32.mrb[28].mxu0  ;;  %1900 = vmatmul.mubr.f32.gmra.mrb[42].mxu1 %v1598_v2 }
 0x21c   : > { %3453 = vpow2.f32 %v2805_v16  ;;  %v5067_v28 = vadd.f32 %v4936_v30, %v1345_v5  ;;  %v1237_v24 = vadd.f32 %v4941_v59, %v1011_v32  ;;  %v1013_v52 = vpop.f32.mrb[29].mxu0  ;;  %v1601_v20 = vmul.f32 %v3444_v13, %v4999_v22  ;;  %3295 = vmatpush3.bf16.msra.mxu1 %v4899_v23 }
 0x21d   : > { %3455 = vrcp.f32 %v1508_v46  ;;  %3288 = vmatprep.subr.bf16.mxu1 %v4908_v6 }
 0x21e   : > { %v3446_v3 = vpop.eup %3445  ;;  %v2806_v38 = vmul.f32 -1.442695, %v5067_v28  ;;  %v1346_v49 = vmul.f32 %v4934_v31, %v1237_v24  ;;  %1904 = vmatprep.mubr.f32.mxu1 %v1601_v20  ;;  %3080 = vmatprep.mubr.f32.mxu0 %v1601_v20 }
 0x21f   : > { %v3448_v11 = vpop.eup %3447  ;;  %v1509_v2 = vadd.f32 1.0, %v3446_v3  ;;  %v1016_v15 = vpop.f32.mrb[30].mxu0  ;;  %1905 = vmatmul.mubr.f32.gmra.mrb[44].mxu1 %v1599_v50 }
 0x220   : > { %3457 = vpow2.f32 %v2806_v38  ;;  %v5076_v59 = vadd.f32 %v4936_v30, %v1346_v49  ;;  %v1242_v23 = vadd.f32 %v4938_v51, %v1016_v15  ;;  %v1018_v22 = vpop.f32.mrb[31].mxu0  ;;  %v1602_v29 = vmul.f32 %v3448_v11, %v5009_v25  ;;  %3296 = vmatpush3.bf16.msra.mxu1 %v4908_v6 }
 0x221   : > { %3459 = vrcp.f32 %v1509_v2  ;;  %3289 = vmatprep.subr.bf16.mxu1 %v4914_v39 }
 0x222   : > { %v3450_v14 = vpop.eup %3449  ;;  %v2807_v37 = vmul.f32 -1.442695, %v5076_v59  ;;  %v1347_v35 = vmul.f32 %v4934_v31, %v1242_v23  ;;  %1909 = vmatprep.mubr.f32.mxu1 %v1602_v29  ;;  %3081 = vmatmul.mubr.f32.gmra.mrb[68].mxu0 %v1602_v29 }
 0x223   : > { %v3452_v27 = vpop.eup %3451  ;;  %v1510_v33 = vadd.f32 1.0, %v3450_v14  ;;  %v1021_v26 = vpop.f32.mrb[32].mxu0  ;;  %1910 = vmatmul.mubr.f32.gmra.mrb[46].mxu1 %v1600_v48 }
 0x224   : > { %3461 = vpow2.f32 %v2807_v37  ;;  %v5085_v51 = vadd.f32 %v4936_v30, %v1347_v35  ;;  %v1247_v6 = vadd.f32 %v4950_v56, %v1021_v26  ;;  %v1023_v25 = vpop.f32.mrb[33].mxu0  ;;  %v1603_v50 = vmul.f32 %v3452_v27, %v5021_v36  ;;  %3297 = vmatpush3.bf16.msra.mxu1 %v4914_v39 }
 0x225   : > { %3463 = vrcp.f32 %v1510_v33 }
 0x226   : > { %v3454_v41 = vpop.eup %3453  ;;  %v2808_v9 = vmul.f32 -1.442695, %v5085_v51  ;;  %v1348_v34 = vmul.f32 %v4934_v31, %v1247_v6  ;;  %1914 = vmatprep.mubr.f32.mxu1 %v1603_v50  ;;  %3083 = vmatprep.mubr.f32.mxu0 %v1603_v50 }
 0x227   : > { %v3456_v44 = vpop.eup %3455  ;;  %v1511_v12 = vadd.f32 1.0, %v3454_v41  ;;  %v1026_v47 = vpop.f32.mrb[34].mxu0  ;;  %1915 = vmatmul.mubr.f32.gmra.mrb[48].mxu1 %v1601_v20 }
 0x228   : > { %3465 = vpow2.f32 %v2808_v9  ;;  %v5093_v56 = vadd.f32 %v4936_v30, %v1348_v34  ;;  %v1252_v36 = vadd.f32 %v4946_v19, %v1026_v47  ;;  %v1028_v63 = vpop.f32.mrb[35].mxu0  ;;  %v1604_v39 = vmul.f32 %v3456_v44, %v5031_v62 }
 0x229   : > { %3467 = vrcp.f32 %v1511_v12 }
 0x22a   : > { %v3458_v42 = vpop.eup %3457  ;;  %v2809_v48 = vmul.f32 -1.442695, %v5093_v56  ;;  %v1349_v1 = vmul.f32 %v4934_v31, %v1252_v36  ;;  %1919 = vmatprep.mubr.f32.mxu1 %v1604_v39  ;;  %3084 = vmatmul.mubr.f32.gmra.mrb[70].mxu0 %v1604_v39 }
 0x22b   : > { %v3460_v16 = vpop.eup %3459  ;;  %v1512_v5 = vadd.f32 1.0, %v3458_v42  ;;  %v1031_v13 = vpop.f32.mrb[36].mxu0  ;;  %1920 = vmatmul.mubr.f32.gmra.mrb[50].mxu1 %v1602_v29 }
 0x22c   : > { %3469 = vpow2.f32 %v2809_v48  ;;  %v5100_v46 = vadd.f32 %v4936_v30, %v1349_v1  ;;  %v1257_v19 = vadd.f32 %v4959_v18, %v1031_v13  ;;  %v1033_v32 = vpop.f32.mrb[37].mxu0  ;;  %v1605_v62 = vmul.f32 %v3460_v16, %v5040_v61 }
 0x22d   : > { %3471 = vrcp.f32 %v1512_v5 }
 0x22e   : > { %v3462_v24 = vpop.eup %3461  ;;  %v2810_v52 = vmul.f32 -1.442695, %v5100_v46  ;;  %v1350_v20 = vmul.f32 %v4934_v31, %v1257_v19  ;;  %1924 = vmatprep.mubr.f32.mxu1 %v1605_v62  ;;  %3086 = vmatprep.mubr.f32.mxu0 %v1605_v62 }
 0x22f   : > { %v3464_v3 = vpop.eup %3463  ;;  %v1513_v38 = vadd.f32 1.0, %v3462_v24  ;;  %v1036_v49 = vpop.f32.mrb[38].mxu0  ;;  %1925 = vmatmul.mubr.f32.gmra.mrb[52].mxu1 %v1603_v50 }
 0x230   : > { %3473 = vpow2.f32 %v2810_v52  ;;  %v5107_v11 = vadd.f32 %v4936_v30, %v1350_v20  ;;  %v1262_v18 = vadd.f32 %v4955_v54, %v1036_v49  ;;  %v1038_v2 = vpop.f32.mrb[39].mxu0  ;;  %v1606_v61 = vmul.f32 %v3464_v3, %v5049_v43 }
 0x231   : > { %3475 = vrcp.f32 %v1513_v38 }
 0x232   : > { %v3466_v15 = vpop.eup %3465  ;;  %v2811_v23 = vmul.f32 -1.442695, %v5107_v11  ;;  %v1351_v22 = vmul.f32 %v4934_v31, %v1262_v18  ;;  %1929 = vmatprep.mubr.f32.mxu1 %v1606_v61  ;;  %3087 = vmatmul.mubr.f32.gmra.mrb[72].mxu0 %v1606_v61 }
 0x233   : > { %v3468_v29 = vpop.eup %3467  ;;  %v1514_v14 = vadd.f32 1.0, %v3466_v15  ;;  %v1041_v37 = vpop.f32.mrb[40].mxu0  ;;  %1930 = vmatmul.mubr.f32.gmra.mrb[54].mxu1 %v1604_v39 }
 0x234   : > { %3477 = vpow2.f32 %v2811_v23  ;;  %v5114_v35 = vadd.f32 %v4936_v30, %v1351_v22  ;;  %v1267_v54 = vadd.f32 %v4968_v55, %v1041_v37  ;;  %v1043_v27 = vpop.f32.mrb[41].mxu0  ;;  %v1607_v43 = vmul.f32 %v3468_v29, %v5058_v57 }
 0x235   : > { %3479 = vrcp.f32 %v1514_v14 }
 0x236   : > { %v3470_v33 = vpop.eup %3469  ;;  %v2812_v26 = vmul.f32 -1.442695, %v5114_v35  ;;  %v1352_v6 = vmul.f32 %v4934_v31, %v1267_v54  ;;  %1934 = vmatprep.mubr.f32.mxu1 %v1607_v43  ;;  %3089 = vmatprep.mubr.f32.mxu0 %v1607_v43 }
 0x237   : > { %v3472_v25 = vpop.eup %3471  ;;  %v1515_v50 = vadd.f32 1.0, %v3470_v33  ;;  %v1046_v41 = vpop.f32.mrb[42].mxu0  ;;  %1935 = vmatmul.mubr.f32.gmra.mrb[56].mxu1 %v1605_v62 }
 0x238   : > { %3481 = vpow2.f32 %v2812_v26  ;;  %v5121_v9 = vadd.f32 %v4936_v30, %v1352_v6  ;;  %v1272_v55 = vadd.f32 %v4964_v58, %v1046_v41  ;;  %v1048_v34 = vpop.f32.mrb[43].mxu0  ;;  %v1608_v57 = vmul.f32 %v3472_v25, %v5067_v28 }
 0x239   : > { %3483 = vrcp.f32 %v1515_v50 }
 0x23a   : > { %v3474_v44 = vpop.eup %3473  ;;  %v2813_v12 = vmul.f32 -1.442695, %v5121_v9  ;;  %v1353_v47 = vmul.f32 %v4934_v31, %v1272_v55  ;;  %1939 = vmatprep.mubr.f32.mxu1 %v1608_v57  ;;  %3090 = vmatmul.mubr.f32.gmra.mrb[74].mxu0 %v1608_v57 }
 0x23b   : > { %v3476_v36 = vpop.eup %3475  ;;  %v1516_v63 = vadd.f32 1.0, %v3474_v44  ;;  %v1051_v39 = vpop.f32.mrb[44].mxu0  ;;  %1940 = vmatmul.mubr.f32.gmra.mrb[58].mxu1 %v1606_v61 }
 0x23c   : > { %3485 = vpow2.f32 %v2813_v12  ;;  %v5128_v42 = vadd.f32 %v4936_v30, %v1353_v47  ;;  %v1277_v58 = vadd.f32 %v4977_v0, %v1051_v39  ;;  %v1053_v48 = vpop.f32.mrb[45].mxu0  ;;  %v1609_v28 = vmul.f32 %v3476_v36, %v5076_v59 }
 0x23d   : > { %3487 = vrcp.f32 %v1516_v63 }
 0x23e   : > { %v3478_v1 = vpop.eup %3477  ;;  %v2814_v16 = vmul.f32 -1.442695, %v5128_v42  ;;  %v1354_v5 = vmul.f32 %v4934_v31, %v1277_v58  ;;  %1944 = vmatprep.mubr.f32.mxu1 %v1609_v28  ;;  %3092 = vmatprep.mubr.f32.mxu0 %v1609_v28 }
 0x23f   : > { %v3480_v13 = vpop.eup %3479  ;;  %v1517_v19 = vadd.f32 1.0, %v3478_v1  ;;  %v1056_v32 = vpop.f32.mrb[46].mxu0  ;;  %1945 = vmatmul.mubr.f32.gmra.mrb[60].mxu1 %v1607_v43 }
 0x240   : > { %3489 = vpow2.f32 %v2814_v16  ;;  %v5135_v62 = vadd.f32 %v4936_v30, %v1354_v5  ;;  %v1282_v0 = vadd.f32 %v4973_v40, %v1056_v32  ;;  %v1058_v24 = vpop.f32.mrb[47].mxu0  ;;  %v1610_v59 = vmul.f32 %v3480_v13, %v5085_v51 }
 0x241   : > { %3491 = vrcp.f32 %v1517_v19 }
 0x242   : > { %v3482_v52 = vpop.eup %3481  ;;  %v2815_v20 = vmul.f32 -1.442695, %v5135_v62  ;;  %v1355_v3 = vmul.f32 %v4934_v31, %v1282_v0  ;;  %1949 = vmatprep.mubr.f32.mxu1 %v1610_v59  ;;  %3093 = vmatmul.mubr.f32.gmra.mrb[76].mxu0 %v1610_v59 }
 0x243   : > { %v3484_v38 = vpop.eup %3483  ;;  %v1518_v49 = vadd.f32 1.0, %v3482_v52  ;;  %v1061_v18 = vpop.f32.mrb[48].mxu0  ;;  %1950 = vmatmul.mubr.f32.gmra.mrb[62].mxu1 %v1608_v57 }
 0x244   : > { %3493 = vpow2.f32 %v2815_v20  ;;  %v5142_v2 = vadd.f32 %v4936_v30, %v1355_v3  ;;  %v1287_v40 = vadd.f32 %v4986_v45, %v1061_v18  ;;  %v1063_v61 = vpop.f32.mrb[49].mxu0  ;;  %v1611_v51 = vmul.f32 %v3484_v38, %v5093_v56 }
 0x245   : > { %3495 = vrcp.f32 %v1518_v49 }
 0x246   : > { %v3486_v15 = vpop.eup %3485  ;;  %v2816_v23 = vmul.f32 -1.442695, %v5142_v2  ;;  %v1356_v22 = vmul.f32 %v4934_v31, %v1287_v40  ;;  %1954 = vmatprep.mubr.f32.mxu1 %v1611_v51  ;;  %3095 = vmatprep.mubr.f32.mxu0 %v1611_v51 }
 0x247   : > { %v3488_v29 = vpop.eup %3487  ;;  %v1519_v14 = vadd.f32 1.0, %v3486_v15  ;;  %v1066_v37 = vpop.f32.mrb[50].mxu0  ;;  %1955 = vmatmul.mubr.f32.gmra.mrb[64].mxu1 %v1609_v28 }
 0x248   : > { %3497 = vpow2.f32 %v2816_v23  ;;  %v5149_v54 = vadd.f32 %v4936_v30, %v1356_v22  ;;  %v1292_v45 = vadd.f32 %v4982_v21, %v1066_v37  ;;  %v1068_v27 = vpop.f32.mrb[51].mxu0  ;;  %v1612_v56 = vmul.f32 %v3488_v29, %v5100_v46 }
 0x249   : > { %3499 = vrcp.f32 %v1519_v14 }
 0x24a   : > { %v3490_v43 = vpop.eup %3489  ;;  %v2817_v33 = vmul.f32 -1.442695, %v5149_v54  ;;  %v1357_v26 = vmul.f32 %v4934_v31, %v1292_v45  ;;  %1959 = vmatprep.mubr.f32.mxu1 %v1612_v56  ;;  %3096 = vmatmul.mubr.f32.gmra.mrb[78].mxu0 %v1612_v56 }
 0x24b   : > { %v3492_v6 = vpop.eup %3491  ;;  %v1520_v25 = vadd.f32 1.0, %v3490_v43  ;;  %v1071_v50 = vpop.f32.mrb[52].mxu0  ;;  %1960 = vmatmul.mubr.f32.gmra.mrb[66].mxu1 %v1610_v59 }
 0x24c   : > { %3501 = vpow2.f32 %v2817_v33  ;;  %v5156_v41 = vadd.f32 %v4936_v30, %v1357_v26  ;;  %v1297_v21 = vadd.f32 %v4996_v4, %v1071_v50  ;;  %v1073_v55 = vpop.f32.mrb[53].mxu0  ;;  %v1613_v46 = vmul.f32 %v3492_v6, %v5107_v11 }
 0x24d   : > { %3503 = vrcp.f32 %v1520_v25 }
 0x24e   : > { %v3494_v34 = vpop.eup %3493  ;;  %v2818_v57 = vmul.f32 -1.442695, %v5156_v41  ;;  %v1358_v44 = vmul.f32 %v4934_v31, %v1297_v21  ;;  %1964 = vmatprep.mubr.f32.mxu1 %v1613_v46  ;;  %3098 = vmatprep.mubr.f32.mxu0 %v1613_v46 }
 0x24f   : > { %v3496_v12 = vpop.eup %3495  ;;  %v1521_v47 = vadd.f32 1.0, %v3494_v34  ;;  %v1076_v36 = vpop.f32.mrb[54].mxu0  ;;  %1965 = vmatmul.mubr.f32.gmra.mrb[68].mxu1 %v1611_v51 }
 0x250   : > { %3505 = vpow2.f32 %v2818_v57  ;;  %v5163_v63 = vadd.f32 %v4936_v30, %v1358_v44  ;;  %v1302_v4 = vadd.f32 %v4992_v7, %v1076_v36  ;;  %v1078_v39 = vpop.f32.mrb[55].mxu0  ;;  %v1614_v11 = vmul.f32 %v3496_v12, %v5114_v35 }
 0x251   : > { %3507 = vrcp.f32 %v1521_v47 }
 0x252   : > { %v3498_v58 = vpop.eup %3497  ;;  %v2819_v48 = vmul.f32 -1.442695, %v5163_v63  ;;  %v1359_v28 = vmul.f32 %v4934_v31, %v1302_v4  ;;  %1969 = vmatprep.mubr.f32.mxu1 %v1614_v11  ;;  %3099 = vmatmul.mubr.f32.gmra.mrb[80].mxu0 %v1614_v11 }
 0x253   : > { %v3500_v1 = vpop.eup %3499  ;;  %v1522_v16 = vadd.f32 1.0, %v3498_v58  ;;  %v1081_v5 = vpop.f32.mrb[56].mxu0  ;;  %1970 = vmatmul.mubr.f32.gmra.mrb[70].mxu1 %v1612_v56 }
 0x254   : > { %3509 = vpow2.f32 %v2819_v48  ;;  %v5170_v13 = vadd.f32 %v4936_v30, %v1359_v28  ;;  %v1307_v7 = vadd.f32 %v5006_v53, %v1081_v5  ;;  %v1083_v19 = vpop.f32.mrb[57].mxu0  ;;  %v1615_v35 = vmul.f32 %v3500_v1, %v5121_v9 }
 0x255   : > { %3511 = vrcp.f32 %v1522_v16 }
 0x256   : > { %v3502_v32 = vpop.eup %3501  ;;  %v2820_v0 = vmul.f32 -1.442695, %v5170_v13  ;;  %v1360_v24 = vmul.f32 %v4934_v31, %v1307_v7  ;;  %1974 = vmatprep.mubr.f32.mxu1 %v1615_v35  ;;  %3101 = vmatprep.mubr.f32.mxu0 %v1615_v35 }
 0x257   : > { %v3504_v59 = vpop.eup %3503  ;;  %v1523_v52 = vadd.f32 1.0, %v3502_v32  ;;  %v1086_v20 = vpop.f32.mrb[58].mxu0  ;;  %1975 = vmatmul.mubr.f32.gmra.mrb[72].mxu1 %v1613_v46 }
 0x258   : > { %3513 = vpow2.f32 %v2820_v0  ;;  %v5177_v3 = vadd.f32 %v4936_v30, %v1360_v24  ;;  %v1312_v53 = vadd.f32 %v5002_v60, %v1086_v20  ;;  %v1088_v38 = vpop.f32.mrb[59].mxu0  ;;  %v1616_v9 = vmul.f32 %v3504_v59, %v5128_v42 }
 0x259   : > { %3515 = vrcp.f32 %v1523_v52  ;;  %v5203_v52 = vld [vmem:[#allocation12] ss:$0 sm:$0xff]  ;;  %v5205_v38 = vld [vmem:[#allocation14] ss:$0 sm:$0xff] }
 0x25a   : > { %v3506_v49 = vpop.eup %3505  ;;  %v2821_v18 = vmul.f32 -1.442695, %v5177_v3  ;;  %v1361_v40 = vmul.f32 %v4934_v31, %v1312_v53  ;;  %1979 = vmatprep.mubr.f32.mxu1 %v1616_v9  ;;  %3102 = vmatmul.mubr.f32.gmra.mrb[82].mxu0 %v1616_v9 }
 0x25b   : > { %v3508_v61 = vpop.eup %3507  ;;  %v1524_v51 = vadd.f32 1.0, %v3506_v49  ;;  %v1091_v15 = vpop.f32.mrb[60].mxu0  ;;  %1980 = vmatmul.mubr.f32.gmra.mrb[74].mxu1 %v1614_v11 }
 0x25c   : > { %3517 = vpow2.f32 %v2821_v18  ;;  %v5184_v23 = vadd.f32 %v4936_v30, %v1361_v40  ;;  %v1317_v60 = vadd.f32 %v5017_v17, %v1091_v15  ;;  %v1093_v22 = vpop.f32.mrb[61].mxu0  ;;  %v1617_v42 = vmul.f32 %v3508_v61, %v5135_v62 }
 0x25d   : > { %3519 = vrcp.f32 %v1524_v51 }
 0x25e   : > { %v3510_v29 = vpop.eup %3509  ;;  %v2822_v14 = vmul.f32 -1.442695, %v5184_v23  ;;  %v1362_v37 = vmul.f32 %v4934_v31, %v1317_v60  ;;  %1984 = vmatprep.mubr.f32.mxu1 %v1617_v42  ;;  %3104 = vmatprep.mubr.f32.mxu0 %v1617_v42 }
 0x25f   : > { %v3512_v45 = vpop.eup %3511  ;;  %v1525_v27 = vadd.f32 1.0, %v3510_v29  ;;  %v1096_v56 = vpop.f32.mrb[62].mxu0  ;;  %1985 = vmatmul.mubr.f32.gmra.mrb[76].mxu1 %v1615_v35 }
 0x260   : > { %3521 = vpow2.f32 %v2822_v14  ;;  %v1401_v43 = vadd.f32 %v4936_v30, %v1362_v37  ;;  %v1322_v17 = vadd.f32 %v5013_v8, %v1096_v56  ;;  %v1098_v33 = vpop.f32.mrb[63].mxu0  ;;  %v1618_v62 = vmul.f32 %v3512_v45, %v5142_v2 }
 0x261   : > { %3523 = vrcp.f32 %v1525_v27 }
 0x262   : > { %v3514_v26 = vpop.eup %3513  ;;  %v2823_v6 = vmul.f32 -1.442695, %v1401_v43  ;;  %v1363_v25 = vmul.f32 %v4934_v31, %v1322_v17  ;;  %1989 = vmatprep.mubr.f32.mxu1 %v1618_v62  ;;  %3105 = vmatmul.mubr.f32.gmra.mrb[84].mxu0 %v1618_v62 }
 0x263   : > { %v3516_v50 = vpop.eup %3515  ;;  %v1526_v21 = vadd.f32 1.0, %v3514_v26  ;;  %1990 = vmatmul.mubr.f32.gmra.mrb[78].mxu1 %v1616_v9 }
 0x264   : > { %3525 = vpow2.f32 %v2823_v6  ;;  %v1402_v55 = vadd.f32 %v4936_v30, %v1363_v25  ;;  %v1619_v46 = vmul.f32 %v3516_v50, %v5149_v54 }
 0x265   : > { %3527 = vrcp.f32 %v1526_v21 }
 0x266   : > { %v3518_v8 = vpop.eup %3517  ;;  %v2824_v34 = vmul.f32 -1.442695, %v1402_v55  ;;  %1994 = vmatprep.mubr.f32.mxu1 %v1619_v46  ;;  %3107 = vmatprep.mubr.f32.mxu0 %v1619_v46 }
 0x267   : > { %v3520_v2 = vpop.eup %3519  ;;  %v1527_v57 = vadd.f32 1.0, %v3518_v8  ;;  %1995 = vmatmul.mubr.f32.gmra.mrb[80].mxu1 %v1617_v42 }
 0x268   : > { %3529 = vpow2.f32 %v2824_v34  ;;  %v1620_v31 = vmul.f32 %v3520_v2, %v5156_v41 }
 0x269   : > { %3531 = vrcp.f32 %v1527_v57 }
 0x26a   : > { %v3522_v44 = vpop.eup %3521  ;;  %1999 = vmatprep.mubr.f32.mxu1 %v1620_v31  ;;  %3108 = vmatmul.mubr.f32.gmra.mrb[86].mxu0 %v1620_v31 }
 0x26b   : > { %v3524_v12 = vpop.eup %3523  ;;  %v1528_v47 = vadd.f32 1.0, %v3522_v44  ;;  %2000 = vmatmul.mubr.f32.gmra.mrb[82].mxu1 %v1618_v62 }
 0x26c   : > { %v1621_v30 = vmul.f32 %v3524_v12, %v5163_v63 }
 0x26d   : > { %3533 = vrcp.f32 %v1528_v47 }
 0x26e   : > { %v3526_v54 = vpop.eup %3525  ;;  %2004 = vmatprep.mubr.f32.mxu1 %v1621_v30 }
 0x26f   : > { %v3528_v36 = vpop.eup %3527  ;;  %v1529_v4 = vadd.f32 1.0, %v3526_v54  ;;  %2005 = vmatmul.mubr.f32.gmra.mrb[84].mxu1 %v1619_v46 }
 0x270   : > { %v1622_v39 = vmul.f32 %v3528_v36, %v5170_v13 }
 0x271   : > { %3535 = vrcp.f32 %v1529_v4 }
 0x272   : > { %v3530_v11 = vpop.eup %3529  ;;  %2009 = vmatprep.mubr.f32.mxu1 %v1622_v39 }
 0x273   : > { %v3532_v41 = vpop.eup %3531  ;;  %v1530_v58 = vadd.f32 1.0, %v3530_v11  ;;  %2010 = vmatmul.mubr.f32.gmra.mrb[86].mxu1 %v1620_v31 }
 0x274   : > { %v1623_v48 = vmul.f32 %v3532_v41, %v5177_v3 }
 0x275   : > { %3537 = vrcp.f32 %v1530_v58 }
 0x276   : > { %2014 = vmatprep.mubr.f32.mxu1 %v1623_v48 }
 0x277   : > { %v3534_v28 = vpop.eup %3533  ;;  %2015 = vmatmul.mubr.f32.gmra.mrb[88].mxu1 %v1621_v30 }
 0x278   : > { %v1624_v63 = vmul.f32 %v3534_v28, %v5184_v23 }
 0x27a   : > { %2019 = vmatprep.mubr.f32.mxu1 %v1624_v63 }
 0x27b   : > { %v3536_v1 = vpop.eup %3535  ;;  %2020 = vmatmul.mubr.f32.gmra.mrb[90].mxu1 %v1622_v39 }
 0x27c   : > { %v1625_v16 = vmul.f32 %v3536_v1, %v1401_v43 }
 0x27e   : > { %2024 = vmatprep.mubr.f32.mxu1 %v1625_v16 }
 0x27f   : > { %v3538_v5 = vpop.eup %3537  ;;  %2025 = vmatmul.mubr.f32.gmra.mrb[92].mxu1 %v1623_v48 }
 0x280   : > { %v1626_v13 = vmul.f32 %v3538_v5, %v1402_v55 }
 0x282   : > { %2029 = vmatprep.mubr.f32.mxu1 %v1626_v13 }
 0x283   : > { %2030 = vmatmul.mubr.f32.gmra.mrb[94].mxu1 %v1624_v63 }
 0x284   : > { %3110 = vmatprep.mubr.f32.mxu1 %v1621_v30 }
 0x287   : > { %3111 = vmatmul.mubr.f32.vlgmr.msra.gmra.mrb[96].mxu1 %v1622_v39 }
 0x288   : > { %3113 = vmatprep.mubr.f32.mxu1 %v1623_v48 }
 0x28b   : > { %3114 = vmatmul.mubr.f32.gmra.mrb[98].mxu1 %v1624_v63 }
 0x28c   : > { %3116 = vmatprep.mubr.f32.mxu1 %v1625_v16 }
 0x28f   : > { %3117 = vmatmul.mubr.f32.gmra.mrb[100].mxu1 %v1626_v13 }
 0x290   : > { %3119 = vmatprep.mubr.f32.mxu1 %v3955_v10 }
 0x293   : > { %3120 = vmatmul.mubr.f32.gmra.mrb[102].mxu1 %v3955_v10 }
 0x2da   : > { %v1876_v7 = vpop.f32.mrb[32].mxu1 }
 0x2db   : > { %v1878_v19 = vpop.f32.mrb[33].mxu1 }
 0x2de   : > { %v1881_v35 = vpop.f32.mrb[34].mxu1 }
 0x2df   : > { %v1883_v32 = vpop.f32.mrb[35].mxu1 }
 0x2e2   : > { %v1886_v0 = vpop.f32.mrb[36].mxu1 }
 0x2e3   : > { %v1888_v24 = vpop.f32.mrb[37].mxu1 }
 0x2e5   : > { %v3076_v59 = vpop.f32.mrb[64].mxu0 }
 0x2e6   : > { %v2107_v20 = vadd.f32 %v3076_v59, %v1881_v35  ;;  %v1891_v3 = vpop.f32.mrb[38].mxu1  ;;  %v2101_v53 = vpop.f32.mrb[65].mxu0 }
 0x2e7   : > { %v2102_v9 = vadd.f32 %v2101_v53, %v1876_v7  ;;  %v1893_v49 = vpop.f32.mrb[39].mxu1 }
 0x2e8   : > { %v2268_v18 = vmul.f32 %v5203_v52, %v2107_v20 }
 0x2e9   : > { %v2267_v10 = vmul.f32 %v5203_v52, %v2102_v9 }
 0x2ea   : > { %v5210_v40 = vadd.f32 %v5205_v38, %v2268_v18  ;;  %v1896_v61 = vpop.f32.mrb[40].mxu1 }
 0x2eb   : > { %v5213_v51 = vadd.f32 %v5205_v38, %v2267_v10  ;;  %v1898_v15 = vpop.f32.mrb[41].mxu1 }
 0x2ec   : > { %v2828_v23 = vmul.f32 -1.442695, %v5210_v40 }
 0x2ed   : > { %v2827_v60 = vmul.f32 -1.442695, %v5213_v51  ;;  %v3079_v22 = vpop.f32.mrb[66].mxu0 }
 0x2ee   : > { %3539 = vpow2.f32 %v2828_v23  ;;  %v2117_v42 = vadd.f32 %v3079_v22, %v1891_v3  ;;  %v1901_v29 = vpop.f32.mrb[42].mxu1  ;;  %v2111_v14 = vpop.f32.mrb[67].mxu0 }
 0x2ef   : > { %3541 = vpow2.f32 %v2827_v60  ;;  %v2112_v37 = vadd.f32 %v2111_v14, %v1886_v0  ;;  %v1903_v45 = vpop.f32.mrb[43].mxu1 }
 0x2f0   : > { %v2270_v27 = vmul.f32 %v5203_v52, %v2117_v42 }
 0x2f1   : > { %v2269_v56 = vmul.f32 %v5203_v52, %v2112_v37 }
 0x2f2   : > { %v5220_v43 = vadd.f32 %v5205_v38, %v2270_v27  ;;  %v1906_v17 = vpop.f32.mrb[44].mxu1 }
 0x2f3   : > { %v5223_v33 = vadd.f32 %v5205_v38, %v2269_v56  ;;  %v1908_v62 = vpop.f32.mrb[45].mxu1 }
 0x2f4   : > { %v2830_v26 = vmul.f32 -1.442695, %v5220_v43 }
 0x2f5   : > { %v2829_v6 = vmul.f32 -1.442695, %v5223_v33  ;;  %v3082_v25 = vpop.f32.mrb[68].mxu0 }
 0x2f6   : > { %3543 = vpow2.f32 %v2830_v26  ;;  %v2127_v50 = vadd.f32 %v3082_v25, %v1901_v29  ;;  %v1911_v21 = vpop.f32.mrb[46].mxu1  ;;  %v2121_v55 = vpop.f32.mrb[69].mxu0 }
 0x2f7   : > { %3545 = vpow2.f32 %v2829_v6  ;;  %v2122_v46 = vadd.f32 %v2121_v55, %v1896_v61  ;;  %v1913_v8 = vpop.f32.mrb[47].mxu1 }
 0x2f8   : > { %v3540_v34 = vpop.eup %3539  ;;  %v2272_v2 = vmul.f32 %v5203_v52, %v2127_v50 }
 0x2f9   : > { %v3542_v57 = vpop.eup %3541  ;;  %v2435_v31 = vadd.f32 1.0, %v3540_v34  ;;  %v2271_v44 = vmul.f32 %v5203_v52, %v2122_v46 }
 0x2fa   : > { %v2434_v12 = vadd.f32 1.0, %v3542_v57  ;;  %v5230_v47 = vadd.f32 %v5205_v38, %v2272_v2  ;;  %v1916_v30 = vpop.f32.mrb[48].mxu1 }
 0x2fb   : > { %3547 = vrcp.f32 %v2435_v31  ;;  %v5233_v54 = vadd.f32 %v5205_v38, %v2271_v44  ;;  %v1918_v36 = vpop.f32.mrb[49].mxu1 }
 0x2fc   : > { %3549 = vrcp.f32 %v2434_v12  ;;  %v2832_v4 = vmul.f32 -1.442695, %v5230_v47 }
 0x2fd   : > { %v2831_v39 = vmul.f32 -1.442695, %v5233_v54  ;;  %v3085_v11 = vpop.f32.mrb[70].mxu0 }
 0x2fe   : > { %3551 = vpow2.f32 %v2832_v4  ;;  %v2137_v41 = vadd.f32 %v3085_v11, %v1911_v21  ;;  %v1921_v58 = vpop.f32.mrb[50].mxu1  ;;  %v2131_v48 = vpop.f32.mrb[71].mxu0 }
 0x2ff   : > { %3553 = vpow2.f32 %v2831_v39  ;;  %v2132_v28 = vadd.f32 %v2131_v48, %v1906_v17  ;;  %v1923_v63 = vpop.f32.mrb[51].mxu1 }
 0x300   : > { %v3544_v1 = vpop.eup %3543  ;;  %v2274_v16 = vmul.f32 %v5203_v52, %v2137_v41 }
 0x301   : > { %v3546_v5 = vpop.eup %3545  ;;  %v2437_v13 = vadd.f32 1.0, %v3544_v1  ;;  %v2273_v7 = vmul.f32 %v5203_v52, %v2132_v28 }
 0x302   : > { %v2436_v19 = vadd.f32 1.0, %v3546_v5  ;;  %v5240_v35 = vadd.f32 %v5205_v38, %v2274_v16  ;;  %v1926_v32 = vpop.f32.mrb[52].mxu1 }
 0x303   : > { %3555 = vrcp.f32 %v2437_v13  ;;  %v5243_v0 = vadd.f32 %v5205_v38, %v2273_v7  ;;  %v1928_v24 = vpop.f32.mrb[53].mxu1 }
 0x304   : > { %3557 = vrcp.f32 %v2436_v19  ;;  %v2834_v59 = vmul.f32 -1.442695, %v5240_v35 }
 0x305   : > { %v3548_v20 = vpop.eup %3547  ;;  %v2833_v3 = vmul.f32 -1.442695, %v5243_v0  ;;  %v3088_v53 = vpop.f32.mrb[72].mxu0 }
 0x306   : > { %v3550_v9 = vpop.eup %3549  ;;  %v2531_v49 = vmul.f32 %v3548_v20, %v5210_v40  ;;  %3559 = vpow2.f32 %v2834_v59  ;;  %v2147_v18 = vadd.f32 %v3088_v53, %v1921_v58  ;;  %v1931_v10 = vpop.f32.mrb[54].mxu1 }
 0x307   : > { %v2141_v61 = vpop.f32.mrb[73].mxu0  ;;  %v2530_v15 = vmul.f32 %v3550_v9, %v5213_v51  ;;  %3561 = vpow2.f32 %v2833_v3  ;;  %v1933_v60 = vpop.f32.mrb[55].mxu1 }
 0x308   : > { %v2142_v23 = vadd.f32 %v2141_v61, %v1916_v30  ;;  %v3552_v22 = vpop.eup %3551  ;;  %2563 = vst [vmem:[%s5251_s8 + $0x8] sm:$0xff] %v2531_v49  ;;  %v2276_v42 = vmul.f32 %v5203_v52, %v2147_v18 }
 0x309   : > { %v3554_v29 = vpop.eup %3553  ;;  %2562 = vst [vmem:[%s5251_s8] sm:$0xff] %v2530_v15  ;;  %v2439_v40 = vadd.f32 1.0, %v3552_v22 }
 0x30a   : > { %v2275_v14 = vmul.f32 %v5203_v52, %v2142_v23  ;;  %v2438_v37 = vadd.f32 1.0, %v3554_v29  ;;  %v5258_v51 = vadd.f32 %v5205_v38, %v2276_v42  ;;  %v1936_v45 = vpop.f32.mrb[56].mxu1 }
 0x30b   : > { %3563 = vrcp.f32 %v2439_v40  ;;  %v1938_v56 = vpop.f32.mrb[57].mxu1 }
 0x30c   : > { %v5261_v27 = vadd.f32 %v5205_v38, %v2275_v14  ;;  %3565 = vrcp.f32 %v2438_v37  ;;  %v2836_v17 = vmul.f32 -1.442695, %v5258_v51 }
 0x30d   : > { %v3556_v62 = vpop.eup %3555  ;;  %v3091_v6 = vpop.f32.mrb[74].mxu0 }
 0x30e   : > { %v2835_v26 = vmul.f32 -1.442695, %v5261_v27  ;;  %v3558_v25 = vpop.eup %3557  ;;  %v2533_v50 = vmul.f32 %v3556_v62, %v5220_v43  ;;  %3567 = vpow2.f32 %v2836_v17  ;;  %v2157_v21 = vadd.f32 %v3091_v6, %v1931_v10  ;;  %v1941_v55 = vpop.f32.mrb[58].mxu1 }
 0x30f   : > { %v2151_v46 = vpop.f32.mrb[75].mxu0  ;;  %v2532_v8 = vmul.f32 %v3558_v25, %v5223_v33  ;;  %v1943_v2 = vpop.f32.mrb[59].mxu1 }
 0x310   : > { %3569 = vpow2.f32 %v2835_v26  ;;  %v2152_v34 = vadd.f32 %v2151_v46, %v1926_v32  ;;  %v3560_v57 = vpop.eup %3559  ;;  %2565 = vst [vmem:[%s5251_s8 + $0x18] sm:$0xff] %v2533_v50  ;;  %v2278_v31 = vmul.f32 %v5203_v52, %v2157_v21 }
 0x311   : > { %v3562_v44 = vpop.eup %3561  ;;  %2564 = vst [vmem:[%s5251_s8 + $0x10] sm:$0xff] %v2532_v8  ;;  %v2441_v12 = vadd.f32 1.0, %v3560_v57 }
 0x312   : > { %v2277_v30 = vmul.f32 %v5203_v52, %v2152_v34  ;;  %v2440_v36 = vadd.f32 1.0, %v3562_v44  ;;  %v5272_v43 = vadd.f32 %v5205_v38, %v2278_v31  ;;  %v1946_v4 = vpop.f32.mrb[60].mxu1 }
 0x313   : > { %3571 = vrcp.f32 %v2441_v12  ;;  %v1948_v39 = vpop.f32.mrb[61].mxu1 }
 0x314   : > { %v5275_v33 = vadd.f32 %v5205_v38, %v2277_v30  ;;  %3573 = vrcp.f32 %v2440_v36  ;;  %v2838_v11 = vmul.f32 -1.442695, %v5272_v43 }
 0x315   : > { %v3564_v41 = vpop.eup %3563  ;;  %v3094_v48 = vpop.f32.mrb[76].mxu0 }
 0x316   : > { %v2837_v58 = vmul.f32 -1.442695, %v5275_v33  ;;  %v3566_v28 = vpop.eup %3565  ;;  %v2535_v63 = vmul.f32 %v3564_v41, %v5230_v47  ;;  %3575 = vpow2.f32 %v2838_v11  ;;  %v2167_v1 = vadd.f32 %v3094_v48, %v1941_v55  ;;  %v1951_v16 = vpop.f32.mrb[62].mxu1 }
 0x317   : > { %v2161_v5 = vpop.f32.mrb[77].mxu0  ;;  %v2534_v13 = vmul.f32 %v3566_v28, %v5233_v54  ;;  %v1953_v19 = vpop.f32.mrb[63].mxu1 }
 0x318   : > { %3577 = vpow2.f32 %v2837_v58  ;;  %v2162_v7 = vadd.f32 %v2161_v5, %v1936_v45  ;;  %v3568_v32 = vpop.eup %3567  ;;  %2567 = vst [vmem:[%s5251_s8 + $0x28] sm:$0xff] %v2535_v63  ;;  %v2280_v24 = vmul.f32 %v5203_v52, %v2167_v1 }
 0x319   : > { %2566 = vst [vmem:[%s5251_s8 + $0x20] sm:$0xff] %v2534_v13  ;;  %v2443_v20 = vadd.f32 1.0, %v3568_v32 }
 0x31a   : > { %v3570_v59 = vpop.eup %3569  ;;  %v2279_v3 = vmul.f32 %v5203_v52, %v2162_v7  ;;  %v5286_v47 = vadd.f32 %v5205_v38, %v2280_v24  ;;  %v1956_v9 = vpop.f32.mrb[64].mxu1 }
 0x31b   : > { %v2442_v53 = vadd.f32 1.0, %v3570_v59  ;;  %3579 = vrcp.f32 %v2443_v20  ;;  %v1958_v49 = vpop.f32.mrb[65].mxu1 }
 0x31c   : > { %v5289_v54 = vadd.f32 %v5205_v38, %v2279_v3  ;;  %v2840_v18 = vmul.f32 -1.442695, %v5286_v47 }
 0x31d   : > { %3581 = vrcp.f32 %v2442_v53  ;;  %v3572_v10 = vpop.eup %3571  ;;  %v3097_v15 = vpop.f32.mrb[78].mxu0 }
 0x31e   : > { %v2839_v61 = vmul.f32 -1.442695, %v5289_v54  ;;  %v3574_v23 = vpop.eup %3573  ;;  %v2537_v60 = vmul.f32 %v3572_v10, %v5240_v35  ;;  %3583 = vpow2.f32 %v2840_v18  ;;  %v2177_v22 = vadd.f32 %v3097_v15, %v1951_v16  ;;  %v1961_v42 = vpop.f32.mrb[66].mxu1 }
 0x31f   : > { %v2171_v29 = vpop.f32.mrb[79].mxu0  ;;  %v2536_v40 = vmul.f32 %v3574_v23, %v5243_v0  ;;  %v1963_v37 = vpop.f32.mrb[67].mxu1 }
 0x320   : > { %3585 = vpow2.f32 %v2839_v61  ;;  %v2172_v14 = vadd.f32 %v2171_v29, %v1946_v4  ;;  %v3576_v45 = vpop.eup %3575  ;;  %2569 = vst [vmem:[%s5251_s8 + $0x38] sm:$0xff] %v2537_v60  ;;  %v2282_v56 = vmul.f32 %v5203_v52, %v2177_v22 }
 0x321   : > { %2568 = vst [vmem:[%s5251_s8 + $0x30] sm:$0xff] %v2536_v40  ;;  %v2445_v62 = vadd.f32 1.0, %v3576_v45 }
 0x322   : > { %v3578_v17 = vpop.eup %3577  ;;  %v2281_v26 = vmul.f32 %v5203_v52, %v2172_v14  ;;  %v5300_v35 = vadd.f32 %v5205_v38, %v2282_v56  ;;  %v1966_v25 = vpop.f32.mrb[68].mxu1 }
 0x323   : > { %v2444_v6 = vadd.f32 1.0, %v3578_v17  ;;  %3587 = vrcp.f32 %v2445_v62  ;;  %v1968_v50 = vpop.f32.mrb[69].mxu1 }
 0x324   : > { %v5303_v0 = vadd.f32 %v5205_v38, %v2281_v26  ;;  %v2842_v21 = vmul.f32 -1.442695, %v5300_v35 }
 0x325   : > { %3589 = vrcp.f32 %v2444_v6  ;;  %v3580_v55 = vpop.eup %3579  ;;  %v3100_v8 = vpop.f32.mrb[80].mxu0 }
 0x326   : > { %v2841_v46 = vmul.f32 -1.442695, %v5303_v0  ;;  %v2539_v2 = vmul.f32 %v3580_v55, %v5258_v51  ;;  %3591 = vpow2.f32 %v2842_v21  ;;  %v2187_v57 = vadd.f32 %v3100_v8, %v1961_v42  ;;  %v1971_v31 = vpop.f32.mrb[70].mxu1  ;;  %v2181_v44 = vpop.f32.mrb[81].mxu0 }
 0x327   : > { %v3582_v34 = vpop.eup %3581  ;;  %v2182_v30 = vadd.f32 %v2181_v44, %v1956_v9  ;;  %v1973_v36 = vpop.f32.mrb[71].mxu1 }
 0x328   : > { %v2538_v12 = vmul.f32 %v3582_v34, %v5261_v27  ;;  %3593 = vpow2.f32 %v2841_v46  ;;  %v3584_v4 = vpop.eup %3583  ;;  %2571 = vst [vmem:[%s5251_s8 + $0x48] sm:$0xff] %v2539_v2  ;;  %v2284_v39 = vmul.f32 %v5203_v52, %v2187_v57 }
 0x329   : > { %v2447_v41 = vadd.f32 1.0, %v3584_v4  ;;  %v2283_v58 = vmul.f32 %v5203_v52, %v2182_v30 }
 0x32a   : > { %v3586_v11 = vpop.eup %3585  ;;  %2570 = vst [vmem:[%s5251_s8 + $0x40] sm:$0xff] %v2538_v12  ;;  %v5314_v51 = vadd.f32 %v5205_v38, %v2284_v39  ;;  %v1976_v28 = vpop.f32.mrb[72].mxu1 }
 0x32b   : > { %v2446_v48 = vadd.f32 1.0, %v3586_v11  ;;  %3595 = vrcp.f32 %v2447_v41  ;;  %v5317_v27 = vadd.f32 %v5205_v38, %v2283_v58  ;;  %v1978_v63 = vpop.f32.mrb[73].mxu1 }
 0x32c   : > { %v2844_v1 = vmul.f32 -1.442695, %v5314_v51 }
 0x32d   : > { %3597 = vrcp.f32 %v2446_v48  ;;  %v3588_v16 = vpop.eup %3587  ;;  %v2843_v5 = vmul.f32 -1.442695, %v5317_v27  ;;  %v3103_v13 = vpop.f32.mrb[82].mxu0 }
 0x32e   : > { %v2541_v19 = vmul.f32 %v3588_v16, %v5272_v43  ;;  %3599 = vpow2.f32 %v2844_v1  ;;  %v2197_v32 = vadd.f32 %v3103_v13, %v1971_v31  ;;  %v1981_v24 = vpop.f32.mrb[74].mxu1  ;;  %v2191_v59 = vpop.f32.mrb[83].mxu0 }
 0x32f   : > { %v3590_v7 = vpop.eup %3589  ;;  %3601 = vpow2.f32 %v2843_v5  ;;  %v2192_v3 = vadd.f32 %v2191_v59, %v1966_v25  ;;  %v1983_v53 = vpop.f32.mrb[75].mxu1 }
 0x330   : > { %v2540_v20 = vmul.f32 %v3590_v7, %v5275_v33  ;;  %v3592_v9 = vpop.eup %3591  ;;  %2573 = vst [vmem:[%s5251_s8 + $0x58] sm:$0xff] %v2541_v19  ;;  %v2286_v49 = vmul.f32 %v5203_v52, %v2197_v32 }
 0x331   : > { %v2449_v10 = vadd.f32 1.0, %v3592_v9  ;;  %v2285_v61 = vmul.f32 %v5203_v52, %v2192_v3 }
 0x332   : > { %v3594_v18 = vpop.eup %3593  ;;  %2572 = vst [vmem:[%s5251_s8 + $0x50] sm:$0xff] %v2540_v20  ;;  %v5328_v43 = vadd.f32 %v5205_v38, %v2286_v49  ;;  %v1986_v23 = vpop.f32.mrb[76].mxu1 }
 0x333   : > { %v2448_v15 = vadd.f32 1.0, %v3594_v18  ;;  %3603 = vrcp.f32 %v2449_v10  ;;  %v5331_v33 = vadd.f32 %v5205_v38, %v2285_v61  ;;  %v1988_v60 = vpop.f32.mrb[77].mxu1 }
 0x334   : > { %v2846_v22 = vmul.f32 -1.442695, %v5328_v43 }
 0x335   : > { %3605 = vrcp.f32 %v2448_v15  ;;  %v3596_v42 = vpop.eup %3595  ;;  %v2845_v29 = vmul.f32 -1.442695, %v5331_v33  ;;  %v3106_v40 = vpop.f32.mrb[84].mxu0 }
 0x336   : > { %v2543_v37 = vmul.f32 %v3596_v42, %v5286_v47  ;;  %3607 = vpow2.f32 %v2846_v22  ;;  %v2207_v45 = vadd.f32 %v3106_v40, %v1981_v24  ;;  %v1991_v56 = vpop.f32.mrb[78].mxu1  ;;  %v2201_v17 = vpop.f32.mrb[85].mxu0 }
 0x337   : > { %v3598_v14 = vpop.eup %3597  ;;  %3609 = vpow2.f32 %v2845_v29  ;;  %v2202_v26 = vadd.f32 %v2201_v17, %v1976_v28  ;;  %v1993_v6 = vpop.f32.mrb[79].mxu1 }
 0x338   : > { %v2542_v62 = vmul.f32 %v3598_v14, %v5289_v54  ;;  %v3600_v25 = vpop.eup %3599  ;;  %2575 = vst [vmem:[%s5251_s8 + $0x68] sm:$0xff] %v2543_v37  ;;  %v2288_v50 = vmul.f32 %v5203_v52, %v2207_v45 }
 0x339   : > { %v3602_v21 = vpop.eup %3601  ;;  %v2451_v55 = vadd.f32 1.0, %v3600_v25  ;;  %v2287_v46 = vmul.f32 %v5203_v52, %v2202_v26 }
 0x33a   : > { %2574 = vst [vmem:[%s5251_s8 + $0x60] sm:$0xff] %v2542_v62  ;;  %v2450_v8 = vadd.f32 1.0, %v3602_v21  ;;  %v5342_v47 = vadd.f32 %v5205_v38, %v2288_v50  ;;  %v5344_v34 = vpop.f32.mrb[80].mxu1 }
 0x33b   : > { %3611 = vrcp.f32 %v2451_v55  ;;  %v5347_v54 = vadd.f32 %v5205_v38, %v2287_v46  ;;  %v1998_v2 = vpop.f32.mrb[81].mxu1 }
 0x33c   : > { %3613 = vrcp.f32 %v2450_v8  ;;  %v2848_v57 = vmul.f32 -1.442695, %v5342_v47 }
 0x33d   : > { %v3604_v31 = vpop.eup %3603  ;;  %v2847_v44 = vmul.f32 -1.442695, %v5347_v54  ;;  %v3109_v12 = vpop.f32.mrb[86].mxu0 }
 0x33e   : > { %v2545_v36 = vmul.f32 %v3604_v31, %v5300_v35  ;;  %3615 = vpow2.f32 %v2848_v57  ;;  %v2217_v4 = vadd.f32 %v3109_v12, %v1991_v56  ;;  %v5352_v39 = vpop.f32.mrb[82].mxu1  ;;  %v2211_v11 = vpop.f32.mrb[87].mxu0 }
 0x33f   : > { %v3606_v30 = vpop.eup %3605  ;;  %3617 = vpow2.f32 %v2847_v44  ;;  %v2212_v58 = vadd.f32 %v2211_v11, %v1986_v23  ;;  %v2003_v48 = vpop.f32.mrb[83].mxu1 }
 0x340   : > { %v2544_v41 = vmul.f32 %v3606_v30, %v5303_v0  ;;  %v3608_v28 = vpop.eup %3607  ;;  %2577 = vst [vmem:[%s5251_s8 + $0x78] sm:$0xff] %v2545_v36  ;;  %v2290_v63 = vmul.f32 %v5203_v52, %v2217_v4 }
 0x341   : > { %v3610_v1 = vpop.eup %3609  ;;  %v2453_v16 = vadd.f32 1.0, %v3608_v28  ;;  %v2289_v5 = vmul.f32 %v5203_v52, %v2212_v58 }
 0x342   : > { %2576 = vst [vmem:[%s5251_s8 + $0x70] sm:$0xff] %v2544_v41  ;;  %v2452_v35 = vadd.f32 1.0, %v3610_v1  ;;  %v2329_v13 = vadd.f32 %v5205_v38, %v2290_v63  ;;  %v5360_v7 = vpop.f32.mrb[84].mxu1 }
 0x343   : > { %3619 = vrcp.f32 %v2453_v16  ;;  %v2328_v0 = vadd.f32 %v5205_v38, %v2289_v5  ;;  %v2008_v19 = vpop.f32.mrb[85].mxu1 }
 0x344   : > { %3621 = vrcp.f32 %v2452_v35  ;;  %v2850_v32 = vmul.f32 -1.442695, %v2329_v13 }
 0x345   : > { %v3612_v24 = vpop.eup %3611  ;;  %v2849_v59 = vmul.f32 -1.442695, %v2328_v0 }
 0x346   : > { %v3614_v20 = vpop.eup %3613  ;;  %v2547_v3 = vmul.f32 %v3612_v24, %v5314_v51  ;;  %3623 = vpow2.f32 %v2850_v32  ;;  %v2011_v53 = vpop.f32.mrb[86].mxu1 }
 0x347   : > { %v2546_v9 = vmul.f32 %v3614_v20, %v5317_v27  ;;  %3625 = vpow2.f32 %v2849_v59  ;;  %v2013_v49 = vpop.f32.mrb[87].mxu1 }
 0x348   : > { %v3616_v18 = vpop.eup %3615  ;;  %2579 = vst [vmem:[%s5251_s8 + $0x88] sm:$0xff] %v2547_v3 }
 0x349   : > { %v3618_v10 = vpop.eup %3617  ;;  %2578 = vst [vmem:[%s5251_s8 + $0x80] sm:$0xff] %v2546_v9  ;;  %v2455_v61 = vadd.f32 1.0, %v3616_v18 }
 0x34a   : > { %v2454_v15 = vadd.f32 1.0, %v3618_v10  ;;  %v2016_v23 = vpop.f32.mrb[88].mxu1 }
 0x34b   : > { %3627 = vrcp.f32 %v2455_v61  ;;  %v2018_v60 = vpop.f32.mrb[89].mxu1 }
 0x34c   : > { %3629 = vrcp.f32 %v2454_v15 }
 0x34d   : > { %v3620_v22 = vpop.eup %3619 }
 0x34e   : > { %v3622_v51 = vpop.eup %3621  ;;  %v2549_v42 = vmul.f32 %v3620_v22, %v5328_v43  ;;  %v2021_v29 = vpop.f32.mrb[90].mxu1 }
 0x34f   : > { %v2548_v27 = vmul.f32 %v3622_v51, %v5331_v33  ;;  %v2023_v40 = vpop.f32.mrb[91].mxu1 }
 0x350   : > { %v3624_v14 = vpop.eup %3623  ;;  %2581 = vst [vmem:[%s5251_s8 + $0x98] sm:$0xff] %v2549_v42 }
 0x351   : > { %v3626_v37 = vpop.eup %3625  ;;  %2580 = vst [vmem:[%s5251_s8 + $0x90] sm:$0xff] %v2548_v27  ;;  %v2457_v45 = vadd.f32 1.0, %v3624_v14 }
 0x352   : > { %v2456_v56 = vadd.f32 1.0, %v3626_v37  ;;  %v2026_v17 = vpop.f32.mrb[92].mxu1 }
 0x353   : > { %3631 = vrcp.f32 %v2457_v45  ;;  %v2028_v62 = vpop.f32.mrb[93].mxu1 }
 0x354   : > { %3633 = vrcp.f32 %v2456_v56 }
 0x355   : > { %v3628_v26 = vpop.eup %3627 }
 0x356   : > { %v3630_v6 = vpop.eup %3629  ;;  %v2551_v43 = vmul.f32 %v3628_v26, %v5342_v47  ;;  %v2031_v25 = vpop.f32.mrb[94].mxu1 }
 0x357   : > { %v2550_v33 = vmul.f32 %v3630_v6, %v5347_v54  ;;  %v2033_v50 = vpop.f32.mrb[95].mxu1 }
 0x358   : > { %2583 = vst [vmem:[%s5251_s8 + $0xa8] sm:$0xff] %v2551_v43 }
 0x359   : > { %2582 = vst [vmem:[%s5251_s8 + $0xa0] sm:$0xff] %v2550_v33 }
 0x35a   : > { %v3112_v21 = vpop.f32.mrb[96].mxu1 }
 0x35b   : > { %v2227_v55 = vadd.f32 %v3112_v21, %v5352_v39  ;;  %v2221_v46 = vpop.f32.mrb[97].mxu1 }
 0x35c   : > { %v2222_v8 = vadd.f32 %v2221_v46, %v5344_v34 }
 0x35d   : > { %v3632_v2 = vpop.eup %3631  ;;  %v2292_v57 = vmul.f32 %v5203_v52, %v2227_v55 }
 0x35e   : > { %v3634_v31 = vpop.eup %3633  ;;  %v2553_v44 = vmul.f32 %v3632_v2, %v2329_v13  ;;  %v2291_v47 = vmul.f32 %v5203_v52, %v2222_v8  ;;  %v3115_v12 = vpop.f32.mrb[98].mxu1 }
 0x35f   : > { %v2552_v54 = vmul.f32 %v3634_v31, %v2328_v0  ;;  %v5380_v30 = vadd.f32 %v5205_v38, %v2292_v57  ;;  %v2237_v36 = vadd.f32 %v3115_v12, %v2011_v53  ;;  %v2231_v4 = vpop.f32.mrb[99].mxu1 }
 0x360   : > { %2585 = vst [vmem:[%s5251_s8 + $0xb8] sm:$0xff] %v2553_v44  ;;  %v5384_v39 = vadd.f32 %v5205_v38, %v2291_v47  ;;  %v2232_v34 = vadd.f32 %v2231_v4, %v5360_v7 }
 0x361   : > { %2584 = vst [vmem:[%s5251_s8 + $0xb0] sm:$0xff] %v2552_v54  ;;  %v2852_v11 = vmul.f32 -1.442695, %v5380_v30  ;;  %v2294_v41 = vmul.f32 %v5203_v52, %v2237_v36 }
 0x362   : > { %v2851_v58 = vmul.f32 -1.442695, %v5384_v39  ;;  %v2293_v48 = vmul.f32 %v5203_v52, %v2232_v34  ;;  %v3118_v28 = vpop.f32.mrb[100].mxu1 }
 0x363   : > { %3635 = vpow2.f32 %v2852_v11  ;;  %v2333_v63 = vadd.f32 %v5205_v38, %v2294_v41  ;;  %v2247_v1 = vadd.f32 %v3118_v28, %v2021_v29  ;;  %v2241_v16 = vpop.f32.mrb[101].mxu1 }
 0x364   : > { %3637 = vpow2.f32 %v2851_v58  ;;  %v2332_v5 = vadd.f32 %v5205_v38, %v2293_v48  ;;  %v2242_v35 = vadd.f32 %v2241_v16, %v2016_v23 }
 0x365   : > { %v2854_v13 = vmul.f32 -1.442695, %v2333_v63  ;;  %v2296_v7 = vmul.f32 %v5203_v52, %v2247_v1 }
 0x366   : > { %v2853_v0 = vmul.f32 -1.442695, %v2332_v5  ;;  %v2295_v19 = vmul.f32 %v5203_v52, %v2242_v35  ;;  %v3121_v32 = vpop.f32.mrb[102].mxu1 }
 0x367   : > { %3639 = vpow2.f32 %v2854_v13  ;;  %v2335_v24 = vadd.f32 %v5205_v38, %v2296_v7  ;;  %v2257_v59 = vadd.f32 %v3121_v32, %v2031_v25  ;;  %v2251_v20 = vpop.f32.mrb[103].mxu1 }
 0x368   : > { %3641 = vpow2.f32 %v2853_v0  ;;  %v2334_v3 = vadd.f32 %v5205_v38, %v2295_v19  ;;  %v2252_v53 = vadd.f32 %v2251_v20, %v2026_v17 }
 0x369   : > { %v2856_v9 = vmul.f32 -1.442695, %v2335_v24  ;;  %v2298_v49 = vmul.f32 %v5203_v52, %v2257_v59 }
 0x36a   : > { %v2855_v18 = vmul.f32 -1.442695, %v2334_v3  ;;  %v2297_v10 = vmul.f32 %v5203_v52, %v2252_v53 }
 0x36b   : > { %3643 = vpow2.f32 %v2856_v9  ;;  %v2337_v61 = vadd.f32 %v5205_v38, %v2298_v49 }
 0x36c   : > { %3645 = vpow2.f32 %v2855_v18  ;;  %v2336_v15 = vadd.f32 %v5205_v38, %v2297_v10 }
 0x36d   : > { %v3636_v23 = vpop.eup %3635  ;;  %v2858_v60 = vmul.f32 -1.442695, %v2337_v61 }
 0x36e   : > { %v3638_v22 = vpop.eup %3637  ;;  %v2459_v51 = vadd.f32 1.0, %v3636_v23  ;;  %v2857_v42 = vmul.f32 -1.442695, %v2336_v15 }
 0x36f   : > { %v2458_v29 = vadd.f32 1.0, %v3638_v22  ;;  %3647 = vpow2.f32 %v2858_v60 }
 0x370   : > { %3649 = vrcp.f32 %v2459_v51 }
 0x371   : > { %v3640_v27 = vpop.eup %3639  ;;  %3651 = vrcp.f32 %v2458_v29 }
 0x372   : > { %v3642_v40 = vpop.eup %3641  ;;  %v2461_v14 = vadd.f32 1.0, %v3640_v27  ;;  %3653 = vpow2.f32 %v2857_v42 }
 0x373   : > { %v2460_v52 = vadd.f32 1.0, %v3642_v40 }
 0x374   : > { %3655 = vrcp.f32 %v2461_v14 }
 0x375   : > { %v3644_v37 = vpop.eup %3643  ;;  %3657 = vrcp.f32 %v2460_v52 }
 0x376   : > { %v3646_v45 = vpop.eup %3645  ;;  %v2463_v38 = vadd.f32 1.0, %v3644_v37 }
 0x377   : > { %v2462_v56 = vadd.f32 1.0, %v3646_v45 }
 0x378   : > { %3659 = vrcp.f32 %v2463_v38 }
 0x379   : > { %v3648_v17 = vpop.eup %3647  ;;  %3661 = vrcp.f32 %v2462_v56 }
 0x37a   : > { %v3650_v62 = vpop.eup %3649  ;;  %v2465_v26 = vadd.f32 1.0, %v3648_v17 }
 0x37b   : > { %v3652_v6 = vpop.eup %3651  ;;  %v2555_v43 = vmul.f32 %v3650_v62, %v5380_v30 }
 0x37c   : > { %v3654_v25 = vpop.eup %3653  ;;  %v2554_v33 = vmul.f32 %v3652_v6, %v5384_v39  ;;  %3663 = vrcp.f32 %v2465_v26 }
 0x37d   : > { %2587 = vst [vmem:[%s5251_s8 + $0xc8] sm:$0xff] %v2555_v43  ;;  %v2464_v50 = vadd.f32 1.0, %v3654_v25 }
 0x37e   : > { %v3656_v21 = vpop.eup %3655  ;;  %2586 = vst [vmem:[%s5251_s8 + $0xc0] sm:$0xff] %v2554_v33 }
 0x37f   : > { %v3658_v55 = vpop.eup %3657  ;;  %v2557_v46 = vmul.f32 %v3656_v21, %v2333_v63  ;;  %3665 = vrcp.f32 %v2464_v50 }
 0x380   : > { %v2556_v8 = vmul.f32 %v3658_v55, %v2332_v5 }
 0x381   : > { %2589 = vst [vmem:[%s5251_s8 + $0xd8] sm:$0xff] %v2557_v46 }
 0x382   : > { %v3660_v2 = vpop.eup %3659  ;;  %2588 = vst [vmem:[%s5251_s8 + $0xd0] sm:$0xff] %v2556_v8 }
 0x383   : > { %v3662_v57 = vpop.eup %3661  ;;  %v2559_v31 = vmul.f32 %v3660_v2, %v2335_v24 }
 0x384   : > { %v2558_v44 = vmul.f32 %v3662_v57, %v2334_v3 }
 0x385   : > { %2591 = vst [vmem:[%s5251_s8 + $0xe8] sm:$0xff] %v2559_v31 }
 0x386   : > { %v3664_v47 = vpop.eup %3663  ;;  %2590 = vst [vmem:[%s5251_s8 + $0xe0] sm:$0xff] %v2558_v44 }
 0x387   : > { %v2561_v12 = vmul.f32 %v3664_v47, %v2337_v61 }
 0x389   : > { %v3666_v54 = vpop.eup %3665  ;;  %2593 = vst [vmem:[%s5251_s8 + $0xf8] sm:$0xff] %v2561_v12 }
 0x38a   : > { %v2560_v30 = vmul.f32 %v3666_v54, %v2336_v15 }
 0x38c   : > { %2592 = vst [vmem:[%s5251_s8 + $0xf0] sm:$0xff] %v2560_v30 }
 0x38d   : > { %3878 = shalt.err (!%p3875_p8)
}
 0x38e   : > { %s3879_s19 = scalar_lea.hbm %s5416_s12, 4096  ;;  %s3883_s8 = scalar_lea.hbm %s5470_s7, 8192 }
 0x38f   : > { %p3880_p4 = scmp.ne.s32.totalorder %s5416_s12, %s3879_s19  ;;  %p3884_p0 = scmp.lt.u32.totalorder %s5416_s12, %s5470_s7 }
 0x390   : > { %p3885_p5 = scmp.lt.u32.totalorder %s3883_s8, %s3879_s19  ;;  %p3887_p6 = scmp.lt.u32.totalorder %s3879_s19, %s5416_s12 }
 0x391   : > { %p3881_p10 = pnand %p3880_p4, %p5560_p9 }
 0x392   : > { %p3886_p7 = por %p3885_p5, %p3884_p0 }
 0x393   : > { %p3882_p11 = pneg %p3881_p10 }
 0x394   : > { %p3888_p12 = por %p3887_p6, %p3886_p7 }
 0x396   : > { %p3889_p13 = pnand %p3888_p12, %p3882_p11 }
 0x398   : > { %3892 = shalt.err (!%p3889_p13)
}
 0x399   : > { %s3957_s9 = smov 128   ;;  %s3958_s16 = smov 8  }
 0x39a   : > { %3324 = dma.vmem_to_hbm [thread:$0]  (%p5560_p9), %s5418_s28, 4096, %s5416_s12, %s2595_s22, %s3957_s9, %s3957_s9, %s3958_s16  }
 0x39b PF: > { %s2623_s30 = sand.u32 1, %s3931_s24   ;;  %p5561_p1 = scmp.ne.s32.totalorder %s5500_s29, 0 }
 0x39c   : > { %p5562_p3 = scmp.ge.s32.totalorder %s3943_s27, 2  ;;  %s2624_s14 = scalar_lea.sflag [#allocation5], %s2623_s30 }
 0x39e   : > { %p3350_p2 = pnand %p5562_p3, %p5561_p1 }
 0x3a0   : > { %3926 = dma.done.wait (!%p3350_p2), %s2624_s14, 4096  }
 0x3a1   : > { %3928 = vsyncadd (!%p3350_p2), %s2624_s14, 4294963200  ;;  %p23_p8 = scmp.ge.s32.totalorder %s4183_s11, 4   ;;  %s5563_s24 = smov %s3935_s25 }
 0x3a2   : > { %s5564_s25 = smov %s3939_s26  ;;  %s5565_s26 = smov %s4194_s18 }
 0x3a3   : > { %s5566_s27 = smov %s4183_s11  ;;  %25 = sbr.rel (!%p23_p8) target bundleno = 8 (0x8), region = 120 }
 0x3aa   :  { %2629 = vsyncpa [#allocation4], 1 }
 0x3ab   :  { %2631 = vsyncpa [#allocation4 + $0x1], 1 }
 0x3ac   :  { %2632 = vsyncpa [#allocation7], 1 }
 0x3ad   :  { %2633 = vsyncpa [#allocation10], 1 }
 0x3ae   :  { %2634 = vsyncpa [#allocation13], 1 }
 0x3af   :  { %2635 = vsyncpa [#allocation5], 1 }
 0x3b0   :  { %2637 = vsyncpa [#allocation5 + $0x1], 1 }

</bundles_post_ra>
